<compile_context>
chip_gen: v5e
topology: v5e:2x2
jax: 0.10.0
libtpu: 0.0.40
codegen_flags: <defaults>
</compile_context>

<pallas_src>
import functools
import math

import jax
import jax.numpy as jnp
from jax import lax
from jax.experimental import pallas as pl
from jax.experimental.pallas import tpu as pltpu


def _l1_distance(a, b):
    """sum_d |a[i,d] - b[j,d]|.  D-chunked accumulation (lane-aligned) when D is large."""
    Sa, D = a.shape
    Sb = b.shape[0]
    chunk = 128
    if D <= chunk:
        return jnp.sum(jnp.abs(a[:, None, :] - b[None, :, :]), axis=-1)
    n_full = D // chunk

    def body(c, acc):
        a_c = lax.dynamic_slice(a, (0, c * chunk), (Sa, chunk))
        b_c = lax.dynamic_slice(b, (0, c * chunk), (Sb, chunk))
        return acc + jnp.sum(jnp.abs(a_c[:, None, :] - b_c[None, :, :]), axis=-1)

    acc = lax.fori_loop(0, n_full, body, jnp.zeros((Sa, Sb), jnp.float32))
    rem = D - n_full * chunk
    if rem:
        acc = acc + jnp.sum(jnp.abs(a[:, None, n_full * chunk:] - b[None, :, n_full * chunk:]),
                            axis=-1)
    return acc


# ----------------------------------------------------------------------------
# Fused kernel: SentEncoder (a & b, all Bt elements, one matmul) -> per-element
# masks / IFE match / masked max pool (pl.loop over Bt) -> batched weight-normed
# fusion Linear + tanh-approx GeLU.   Grid over ceil(B / Bt).
# ----------------------------------------------------------------------------
def fused_gif_kernel(a_ref, b_ref, w1_ref, b1_ref, w2_ref, wf_ref, bf_ref, ab_ref,
                     out_ref, a_sent_scr, b_sent_scr, feat_scr,
                     *, Bt, Sa, Wa, Sb, Wb):
    D = a_ref.shape[-1]

    w1 = w1_ref[...]            # [D, H]   SentEncoder.attn weight (transposed)
    b1 = b1_ref[...]            # [1, H]   SentEncoder.attn bias
    w2 = w2_ref[...]            # [1, H]   SentEncoder.sent weight as a row
    alpha = ab_ref[0, 0]
    beta = ab_ref[0, 1]

    # ---- SentEncoder: a and b word slabs stacked into one MXU matmul + one tanh ----
    Ra = Bt * Sa * Wa
    Rb = Bt * Sb * Wb
    xa = a_ref[...].reshape(Ra, D)
    xb = b_ref[...].reshape(Rb, D)
    x_all = jnp.concatenate([xa, xb], axis=0)                               # [Ra+Rb, D]
    h = jnp.tanh(jnp.dot(x_all, w1, preferred_element_type=jnp.float32) + b1)
    logits = jnp.sum(h * w2, axis=-1, keepdims=True)                        # [Ra+Rb, 1]

    def word_pool(x2d, lg, S, W):
        # softmax over words, then attention-weighted word sum -> [S, D]
        lg3 = lg.reshape(S, W, 1)
        m = jnp.max(lg3, axis=1, keepdims=True)
        e = jnp.exp(lg3 - m)
        p = e / jnp.sum(e, axis=1, keepdims=True)
        return jnp.sum(p * x2d.reshape(S, W, D), axis=1)

    a_sent_scr[...] = word_pool(xa, logits[:Ra], Bt * Sa, Wa)               # [Bt*Sa, D]
    b_sent_scr[...] = word_pool(xb, logits[Ra:Ra + Rb], Bt * Sb, Wb)        # [Bt*Sb, D]

    # ---- per batch element: masks -> IFE match -> masked max pooling -> 4D features ----
    @pl.loop(0, Bt)
    def _(i):
        a_s = a_sent_scr[pl.ds(i * Sa, Sa), :]                              # [Sa, D]
        b_s = b_sent_scr[pl.ds(i * Sb, Sb), :]                              # [Sb, D]

        # masks (torch: ne(sent, 0)[:, :, 0].unsqueeze(2)); pair mask via exact 0/1 matmul
        ma_col = (a_s[:, 0:1] != 0.0).astype(jnp.float32)                   # [Sa, 1]
        mb_col = (b_s[:, 0:1] != 0.0).astype(jnp.float32)                   # [Sb, 1]
        mask_f = lax.dot_general(jnp.broadcast_to(ma_col, (Sa, 8)),
                                 jnp.broadcast_to(mb_col, (Sb, 8)),
                                 (((1,), (1,)), ((), ())),
                                 preferred_element_type=jnp.float32)        # [Sa, Sb]
        mask = mask_f > 0.0

        # IFE matching
        normal = lax.dot_general(a_s, b_s, (((1,), (1,)), ((), ())),
                                 preferred_element_type=jnp.float32) * alpha
        normal = jnp.where(mask, normal, jnp.float32(-1e7))

        l1 = _l1_distance(a_s, b_s)                                         # [Sa, Sb]
        diff = jax.nn.sigmoid(jnp.where(mask, -beta * l1, jnp.float32(-1e7)))
        attn = normal * diff                                                # [Sa, Sb]

        # softmax over Sb (torch dim=2) -> a_mac
        e2 = jnp.exp(attn - jnp.max(attn, axis=1, keepdims=True))
        p2 = e2 / jnp.sum(e2, axis=1, keepdims=True)
        a_mac = jnp.dot(p2, b_s, preferred_element_type=jnp.float32)        # [Sa, D]

        # softmax over Sa (torch dim=1), transposed -> b_mac
        e1 = jnp.exp(attn - jnp.max(attn, axis=0, keepdims=True))
        p1 = e1 / jnp.sum(e1, axis=0, keepdims=True)
        b_mac = lax.dot_general(p1, a_s, (((0,), (0,)), ((), ())),
                                preferred_element_type=jnp.float32)         # [Sb, D]

        # masked max pooling over sentences
        neg_inf = jnp.float32(-jnp.inf)
        a_pool = jnp.max(jnp.where(ma_col > 0.0, a_mac, neg_inf), axis=0, keepdims=True)
        b_pool = jnp.max(jnp.where(mb_col > 0.0, b_mac, neg_inf), axis=0, keepdims=True)

        feat = jnp.concatenate([a_pool, b_pool, a_pool - b_pool, a_pool * b_pool],
                               axis=-1)                                     # [1, 4D]
        feat_scr[pl.ds(i, 1), :] = feat

    # ---- fusion: Dropout(eval identity) + weight-normed Linear(4D -> H) + GeLU, batched ----
    feats = feat_scr[...]                                                   # [Bt, 4D]
    y = jnp.dot(feats, wf_ref[...], preferred_element_type=jnp.float32) + bf_ref[...]
    out = 0.5 * y * (1.0 + jnp.tanh(y * 0.7978845608 * (1.0 + 0.044715 * y * y)))
    out_ref[...] = out                                                      # [Bt, H]


# ----------------------------------------------------------------------------
# Wrapper
# ----------------------------------------------------------------------------
def global_interaction_fusion_forward(a_fus, b_fus, words1, words2, params, block_b=None):
    B, Sa, Wa = words1
    _, Sb, Wb = words2
    D = a_fus.shape[-1]
    H = params["w_attn"].shape[1]

    # Batch tile from a conservative VMEM budget (double-buffered f32 input blocks must
    # fit even on v7x's 64 MiB physical VMEM).
    if block_b is None:
        bytes_per_elem = (Sa * Wa + Sb * Wb) * D * 4
        budget = 24 * 1024 * 1024
        block_b = max(1, min(B, budget // max(1, 2 * bytes_per_elem), 64))
        if block_b < B:
            block_b = max(8, (block_b // 8) * 8)   # keep out-block sublane dim aligned
    Bt = min(block_b, B) if B < 8 else block_b
    Bt = max(1, Bt)

    # Pad batch so the grid divides evenly; padded rows are sliced off after the call.
    Bp = ((B + Bt - 1) // Bt) * Bt
    if Bp != B:
        pad = Bp - B
        a_fus = jnp.concatenate([a_fus, jnp.zeros((pad,) + a_fus.shape[1:], a_fus.dtype)], 0)
        b_fus = jnp.concatenate([b_fus, jnp.zeros((pad,) + b_fus.shape[1:], b_fus.dtype)], 0)

    w_sent_row = params["w_sent"].reshape(1, H)                             # [H,1] -> [1,H]
    alpha_beta = jnp.concatenate([params["alpha"].reshape(1, 1),
                                  params["beta"].reshape(1, 1)], axis=1)    # [1, 2]

    kernel = functools.partial(fused_gif_kernel, Bt=Bt, Sa=Sa, Wa=Wa, Sb=Sb, Wb=Wb)

    out = pl.pallas_call(
        kernel,
        out_shape=jax.ShapeDtypeStruct((Bp, H), jnp.float32),
        grid=(Bp // Bt,),
        in_specs=[
            pl.BlockSpec((Bt, Sa * Wa, D), lambda b: (b, 0, 0)),            # a_fus
            pl.BlockSpec((Bt, Sb * Wb, D), lambda b: (b, 0, 0)),            # b_fus
            pl.BlockSpec((D, H), lambda b: (0, 0)),                         # w_attn
            pl.BlockSpec((1, H), lambda b: (0, 0)),                         # b_attn
            pl.BlockSpec((1, H), lambda b: (0, 0)),                         # w_sent (row)
            pl.BlockSpec((4 * D, H), lambda b: (0, 0)),                     # w_fusion
            pl.BlockSpec((1, H), lambda b: (0, 0)),                         # b_fusion
            pl.BlockSpec(memory_space=pltpu.MemorySpace.SMEM),              # alpha, beta
        ],
        out_specs=pl.BlockSpec((Bt, H), lambda b: (b, 0)),
        scratch_shapes=[
            pltpu.VMEM((Bt * Sa, D), jnp.float32),                          # a_sent
            pltpu.VMEM((Bt * Sb, D), jnp.float32),                          # b_sent
            pltpu.VMEM((Bt, 4 * D), jnp.float32),                           # pooled features
        ],
        compiler_params=pltpu.CompilerParams(
            dimension_semantics=("parallel",),   # on v7x, pltpu.CORE_PARALLEL splits the 2 TCs
            vmem_limit_bytes=48 * 1024 * 1024,
        ),
    )(a_fus, b_fus, params["w_attn"], params["b_attn"], w_sent_row,
      params["w_fusion"], params["b_fusion"], alpha_beta)
    return out[:B]


# ----------------------------------------------------------------------------
# Pure-JAX reference for correctness check
# ----------------------------------------------------------------------------
def reference_forward(a_fus, b_fus, words1, words2, params):
    B, Sa, Wa = words1
    _, Sb, Wb = words2
    D = a_fus.shape[-1]

    def sent_enc(x, W, S):
        a = x.reshape(-1, W, D)
        attn = jnp.tanh(a @ params["w_attn"] + params["b_attn"]) @ params["w_sent"]  # [N,W,1]
        p = jax.nn.softmax(attn, axis=1)
        sent = jnp.matmul(jnp.swapaxes(p, 1, 2), a)[:, 0, :]
        return sent.reshape(B, S, D)

    a_sent = sent_enc(a_fus, Wa, Sa)
    b_sent = sent_enc(b_fus, Wb, Sb)
    ma = (a_sent[:, :, 0:1] != 0.0).astype(jnp.float32)
    mb = (b_sent[:, :, 0:1] != 0.0).astype(jnp.float32)

    alpha = params["alpha"][0, 0]
    beta = params["beta"][0, 0]
    mask = jnp.matmul(ma, jnp.swapaxes(mb, 1, 2)) > 0.0
    normal = jnp.where(mask, jnp.matmul(a_sent, jnp.swapaxes(b_sent, 1, 2)) * alpha, -1e7)
    l1 = jnp.sum(jnp.abs(a_sent[:, :, None, :] - b_sent[:, None, :, :]), axis=-1)
    diff = jax.nn.sigmoid(jnp.where(mask, -beta * l1, -1e7))
    attn = normal * diff
    a_mac = jnp.matmul(jax.nn.softmax(attn, axis=2), b_sent)
    b_mac = jnp.matmul(jnp.swapaxes(jax.nn.softmax(attn, axis=1), 1, 2), a_sent)

    a_pool = jnp.max(jnp.where(ma > 0.0, a_mac, -jnp.inf), axis=1)
    b_pool = jnp.max(jnp.where(mb > 0.0, b_mac, -jnp.inf), axis=1)

    x = jnp.concatenate([a_pool, b_pool, a_pool - b_pool, a_pool * b_pool], axis=-1)
    y = x @ params["w_fusion"] + params["b_fusion"]
    return 0.5 * y * (1.0 + jnp.tanh(y * 0.7978845608 * (1.0 + 0.044715 * y * y)))


# ----------------------------------------------------------------------------
if __name__ == "__main__":
    H = 32                      # hidden_size
    D = 2 * H                   # input_size (hidden_size*4*2 == 4*input_size)
    B, Sa, Wa = 2, 4, 8
    Sb, Wb = 4, 8
    words1 = (B, Sa, Wa)
    words2 = (B, Sb, Wb)

    key = jax.random.PRNGKey(0)
    k_in_a, k_in_b, k1, k2, k3, k4 = jax.random.split(key, 6)

    a_fus = jax.random.normal(k_in_a, (B, Sa * Wa, D), dtype=jnp.float32)
    b_fus = jax.random.normal(k_in_b, (B, Sb * Wb, D), dtype=jnp.float32)

    # ---- deterministic parameter init (shapes per module __init__) ----
    bnd1 = 1.0 / math.sqrt(D)
    bnd2 = 1.0 / math.sqrt(H)
    w_attn = jax.random.uniform(k1, (D, H), jnp.float32, -bnd1, bnd1)      # SentEncoder.attn
    b_attn = jax.random.uniform(k2, (1, H), jnp.float32, -bnd1, bnd1)
    w_sent = jax.random.uniform(k3, (H, 1), jnp.float32, -bnd2, bnd2)      # SentEncoder.sent (no bias)

    alpha = jnp.full((1, 1), 1.0 / math.sqrt(D), jnp.float32)              # IFE.alpha
    beta = jnp.full((1, 1), 1.0 / math.sqrt(D), jnp.float32)               # IFE.beta

    # fusion Linear(4D -> H), weight_norm: w_eff = g * v / ||v||, g init = ||v|| => w_eff == v
    v = jax.random.normal(k4, (H, 4 * D), jnp.float32) * math.sqrt(2.0 / (4 * D))
    g = jnp.linalg.norm(v, axis=1, keepdims=True)
    w_fusion = (g * v / jnp.linalg.norm(v, axis=1, keepdims=True)).T       # [4D, H]
    b_fusion = jnp.zeros((1, H), jnp.float32)

    params = dict(w_attn=w_attn, b_attn=b_attn, w_sent=w_sent,
                  alpha=alpha, beta=beta, w_fusion=w_fusion, b_fusion=b_fusion)

    out = global_interaction_fusion_forward(a_fus, b_fus, words1, words2, params)
    out = jax.block_until_ready(out)

    ref = reference_forward(a_fus, b_fus, words1, words2, params)
    assert out.shape == (B, H), out.shape
    assert jnp.all(jnp.isfinite(out))
    assert jnp.allclose(out, ref, atol=1e-4, rtol=1e-4), (out, ref)

    print("KERNEL_OK")
</pallas_src>

<mosaic_0001>
module attributes {stable_mosaic.version = 11 : i64} {
  func.func @fused_gif_kernel(%arg0: i32, %arg1: memref<2x32x64xf32, #tpu.memory_space<vmem>>, %arg2: memref<2x32x64xf32, #tpu.memory_space<vmem>>, %arg3: memref<64x32xf32, #tpu.memory_space<vmem>>, %arg4: memref<1x32xf32, #tpu.memory_space<vmem>>, %arg5: memref<1x32xf32, #tpu.memory_space<vmem>>, %arg6: memref<256x32xf32, #tpu.memory_space<vmem>>, %arg7: memref<1x32xf32, #tpu.memory_space<vmem>>, %arg8: memref<1x2xf32, #tpu.memory_space<smem>>, %arg9: memref<2x32xf32, #tpu.memory_space<vmem>>, %arg10: memref<8x64xf32, #tpu.memory_space<vmem>>, %arg11: memref<8x64xf32, #tpu.memory_space<vmem>>, %arg12: memref<2x256xf32, #tpu.memory_space<vmem>>) attributes {dimension_semantics = [#tpu.dimension_semantics<parallel>], iteration_bounds = array<i64: 1>, scalar_prefetch = 0 : i64, scratch_operands = 3 : i64, tpu.core_type = #tpu.core_type<tc>, window_params = [{transform_indices = @transform_0, window_bounds = array<i64: 2, 32, 64>}, {transform_indices = @transform_1, window_bounds = array<i64: 2, 32, 64>}, {pipeline_mode = #tpu.pipeline_mode<synchronous>, transform_indices = @transform_2, window_bounds = array<i64: 64, 32>}, {pipeline_mode = #tpu.pipeline_mode<synchronous>, transform_indices = @transform_3, window_bounds = array<i64: 1, 32>}, {pipeline_mode = #tpu.pipeline_mode<synchronous>, transform_indices = @transform_4, window_bounds = array<i64: 1, 32>}, {pipeline_mode = #tpu.pipeline_mode<synchronous>, transform_indices = @transform_5, window_bounds = array<i64: 256, 32>}, {pipeline_mode = #tpu.pipeline_mode<synchronous>, transform_indices = @transform_6, window_bounds = array<i64: 1, 32>}, {transform_indices = @transform_7, window_bounds = array<i64: 1, 2>}, {transform_indices = @transform_8, window_bounds = array<i64: 2, 32>}]} {
    %c0 = arith.constant 0 : index
    %c0_0 = arith.constant 0 : index
    %0 = vector.load %arg3[%c0, %c0_0] : memref<64x32xf32, #tpu.memory_space<vmem>>, vector<64x32xf32>
    %c0_1 = arith.constant 0 : index
    %c0_2 = arith.constant 0 : index
    %1 = vector.load %arg4[%c0_1, %c0_2] : memref<1x32xf32, #tpu.memory_space<vmem>>, vector<1x32xf32>
    %c0_3 = arith.constant 0 : index
    %c0_4 = arith.constant 0 : index
    %2 = vector.load %arg5[%c0_3, %c0_4] : memref<1x32xf32, #tpu.memory_space<vmem>>, vector<1x32xf32>
    %c0_5 = arith.constant 0 : index
    %c0_6 = arith.constant 0 : index
    %3 = memref.load %arg8[%c0_5, %c0_6] : memref<1x2xf32, #tpu.memory_space<smem>>
    %c0_7 = arith.constant 0 : index
    %c1 = arith.constant 1 : index
    %4 = memref.load %arg8[%c0_7, %c1] : memref<1x2xf32, #tpu.memory_space<smem>>
    %c0_8 = arith.constant 0 : index
    %c0_9 = arith.constant 0 : index
    %c0_10 = arith.constant 0 : index
    %5 = vector.load %arg1[%c0_8, %c0_9, %c0_10] : memref<2x32x64xf32, #tpu.memory_space<vmem>>, vector<2x32x64xf32>
    %6 = vector.shape_cast %5 : vector<2x32x64xf32> to vector<64x64xf32>
    %c0_11 = arith.constant 0 : index
    %c0_12 = arith.constant 0 : index
    %c0_13 = arith.constant 0 : index
    %7 = vector.load %arg2[%c0_11, %c0_12, %c0_13] : memref<2x32x64xf32, #tpu.memory_space<vmem>>, vector<2x32x64xf32>
    %8 = vector.shape_cast %7 : vector<2x32x64xf32> to vector<64x64xf32>
    %9 = tpu.concatenate %6, %8 in 0 : vector<64x64xf32>, vector<64x64xf32> -> vector<128x64xf32>
    %cst = arith.constant dense<0.000000e+00> : vector<128x32xf32>
    %10 = tpu.matmul %9, %0, %cst {dimension_numbers = #tpu.dot_dimension_numbers<[1], [0], [0], [1], [0, 0, 1, 1], [], []>} : vector<128x64xf32>, vector<64x32xf32>, vector<128x32xf32> -> vector<128x32xf32>
    %11 = vector.broadcast %1 : vector<1x32xf32> to vector<128x32xf32>
    %12 = arith.addf %10, %11 : vector<128x32xf32>
    %13 = math.tanh %12 : vector<128x32xf32>
    %14 = vector.broadcast %2 : vector<1x32xf32> to vector<128x32xf32>
    %15 = arith.mulf %13, %14 : vector<128x32xf32>
    %cst_14 = arith.constant dense<0.000000e+00> : vector<128xf32>
    %16 = vector.multi_reduction <add>, %15, %cst_14 [1] : vector<128x32xf32> to vector<128xf32>
    %17 = vector.shape_cast %16 : vector<128xf32> to vector<128x1xf32>
    %18 = vector.extract_strided_slice %17 {offsets = [0, 0], sizes = [64, 1], strides = [1, 1]} : vector<128x1xf32> to vector<64x1xf32>
    %19 = vector.shape_cast %18 : vector<64x1xf32> to vector<8x8x1xf32>
    %cst_15 = arith.constant dense<0xFF800000> : vector<8x1xf32>
    %20 = vector.multi_reduction <maximumf>, %19, %cst_15 [1] : vector<8x8x1xf32> to vector<8x1xf32>
    %21 = vector.shape_cast %20 : vector<8x1xf32> to vector<8x1x1xf32>
    %22 = vector.broadcast %21 : vector<8x1x1xf32> to vector<8x8x1xf32>
    %23 = arith.subf %19, %22 : vector<8x8x1xf32>
    %24 = math.exp %23 : vector<8x8x1xf32>
    %cst_16 = arith.constant dense<0.000000e+00> : vector<8x1xf32>
    %25 = vector.multi_reduction <add>, %24, %cst_16 [1] : vector<8x8x1xf32> to vector<8x1xf32>
    %26 = vector.shape_cast %25 : vector<8x1xf32> to vector<8x1x1xf32>
    %27 = vector.broadcast %26 : vector<8x1x1xf32> to vector<8x8x1xf32>
    %28 = arith.divf %24, %27 : vector<8x8x1xf32>
    %29 = vector.shape_cast %6 : vector<64x64xf32> to vector<8x8x64xf32>
    %30 = vector.broadcast %28 : vector<8x8x1xf32> to vector<8x8x64xf32>
    %31 = arith.mulf %30, %29 : vector<8x8x64xf32>
    %cst_17 = arith.constant dense<0.000000e+00> : vector<8x64xf32>
    %32 = vector.multi_reduction <add>, %31, %cst_17 [1] : vector<8x8x64xf32> to vector<8x64xf32>
    %c0_18 = arith.constant 0 : index
    %c0_19 = arith.constant 0 : index
    %33 = vector.load %arg10[%c0_18, %c0_19] : memref<8x64xf32, #tpu.memory_space<vmem>>, vector<8x64xf32>
    tpu.vector_store %arg10[%c0_18, %c0_19], %32 {strides = array<i32>} : memref<8x64xf32, #tpu.memory_space<vmem>>, vector<8x64xf32>,
    %34 = vector.extract_strided_slice %17 {offsets = [64, 0], sizes = [64, 1], strides = [1, 1]} : vector<128x1xf32> to vector<64x1xf32>
    %35 = vector.shape_cast %34 : vector<64x1xf32> to vector<8x8x1xf32>
    %cst_20 = arith.constant dense<0xFF800000> : vector<8x1xf32>
    %36 = vector.multi_reduction <maximumf>, %35, %cst_20 [1] : vector<8x8x1xf32> to vector<8x1xf32>
    %37 = vector.shape_cast %36 : vector<8x1xf32> to vector<8x1x1xf32>
    %38 = vector.broadcast %37 : vector<8x1x1xf32> to vector<8x8x1xf32>
    %39 = arith.subf %35, %38 : vector<8x8x1xf32>
    %40 = math.exp %39 : vector<8x8x1xf32>
    %cst_21 = arith.constant dense<0.000000e+00> : vector<8x1xf32>
    %41 = vector.multi_reduction <add>, %40, %cst_21 [1] : vector<8x8x1xf32> to vector<8x1xf32>
    %42 = vector.shape_cast %41 : vector<8x1xf32> to vector<8x1x1xf32>
    %43 = vector.broadcast %42 : vector<8x1x1xf32> to vector<8x8x1xf32>
    %44 = arith.divf %40, %43 : vector<8x8x1xf32>
    %45 = vector.shape_cast %8 : vector<64x64xf32> to vector<8x8x64xf32>
    %46 = vector.broadcast %44 : vector<8x8x1xf32> to vector<8x8x64xf32>
    %47 = arith.mulf %46, %45 : vector<8x8x64xf32>
    %cst_22 = arith.constant dense<0.000000e+00> : vector<8x64xf32>
    %48 = vector.multi_reduction <add>, %47, %cst_22 [1] : vector<8x8x64xf32> to vector<8x64xf32>
    %c0_23 = arith.constant 0 : index
    %c0_24 = arith.constant 0 : index
    %49 = vector.load %arg11[%c0_23, %c0_24] : memref<8x64xf32, #tpu.memory_space<vmem>>, vector<8x64xf32>
    tpu.vector_store %arg11[%c0_23, %c0_24], %48 {strides = array<i32>} : memref<8x64xf32, #tpu.memory_space<vmem>>, vector<8x64xf32>,
    %c0_i32 = arith.constant 0 : i32
    %c2_i32 = arith.constant 2 : i32
    %50 = arith.addi %c0_i32, %c2_i32 : i32
    %c1_i32 = arith.constant 1 : i32
    scf.for %arg13 = %c0_i32 to %50 step %c1_i32  : i32 {
      %c1_i32_40 = arith.constant 1 : i32
      %72 = arith.muli %arg13, %c1_i32_40 : i32
      %c0_i32_41 = arith.constant 0 : i32
      %73 = arith.addi %c0_i32_41, %72 : i32
      %c4_i32 = arith.constant 4 : i32
      %74 = arith.muli %73, %c4_i32 : i32
      %75 = arith.index_cast %74 : i32 to index
      %c0_42 = arith.constant 0 : index
      %76 = vector.load %arg10[%75, %c0_42] : memref<8x64xf32, #tpu.memory_space<vmem>>, vector<4x64xf32>
      %c4_i32_43 = arith.constant 4 : i32
      %77 = arith.muli %73, %c4_i32_43 : i32
      %78 = arith.index_cast %77 : i32 to index
      %c0_44 = arith.constant 0 : index
      %79 = vector.load %arg11[%78, %c0_44] : memref<8x64xf32, #tpu.memory_space<vmem>>, vector<4x64xf32>
      %80 = vector.extract_strided_slice %76 {offsets = [0, 0], sizes = [4, 1], strides = [1, 1]} : vector<4x64xf32> to vector<4x1xf32>
      %cst_45 = arith.constant 0.000000e+00 : f32
      %81 = vector.broadcast %cst_45 : f32 to vector<4x1xf32>
      %82 = arith.cmpf one, %80, %81 : vector<4x1xf32>
      %83 = arith.extui %82 : vector<4x1xi1> to vector<4x1xi32>
      %84 = arith.sitofp %83 : vector<4x1xi32> to vector<4x1xf32>
      %85 = vector.extract_strided_slice %79 {offsets = [0, 0], sizes = [4, 1], strides = [1, 1]} : vector<4x64xf32> to vector<4x1xf32>
      %cst_46 = arith.constant 0.000000e+00 : f32
      %86 = vector.broadcast %cst_46 : f32 to vector<4x1xf32>
      %87 = arith.cmpf one, %85, %86 : vector<4x1xf32>
      %88 = arith.extui %87 : vector<4x1xi1> to vector<4x1xi32>
      %89 = arith.sitofp %88 : vector<4x1xi32> to vector<4x1xf32>
      %90 = vector.shape_cast %84 : vector<4x1xf32> to vector<4x1xf32>
      %91 = vector.broadcast %90 : vector<4x1xf32> to vector<4x8xf32>
      %92 = vector.shape_cast %89 : vector<4x1xf32> to vector<4x1xf32>
      %93 = vector.broadcast %92 : vector<4x1xf32> to vector<4x8xf32>
      %cst_47 = arith.constant dense<0.000000e+00> : vector<4x4xf32>
      %94 = tpu.matmul %91, %93, %cst_47 {dimension_numbers = #tpu.dot_dimension_numbers<[1], [1], [0], [0], [0, 0, 1, 0], [], []>} : vector<4x8xf32>, vector<4x8xf32>, vector<4x4xf32> -> vector<4x4xf32>
      %cst_48 = arith.constant 0.000000e+00 : f32
      %95 = vector.broadcast %cst_48 : f32 to vector<4x4xf32>
      %96 = arith.cmpf ogt, %94, %95 : vector<4x4xf32>
      %cst_49 = arith.constant dense<0.000000e+00> : vector<4x4xf32>
      %97 = tpu.matmul %76, %79, %cst_49 {dimension_numbers = #tpu.dot_dimension_numbers<[1], [1], [0], [0], [0, 0, 1, 0], [], []>} : vector<4x64xf32>, vector<4x64xf32>, vector<4x4xf32> -> vector<4x4xf32>
      %98 = vector.broadcast %3 : f32 to vector<4x4xf32>
      %99 = arith.mulf %97, %98 : vector<4x4xf32>
      %cst_50 = arith.constant -1.000000e+07 : f32
      %100 = vector.broadcast %cst_50 : f32 to vector<4x4xf32>
      %101 = arith.select %96, %99, %100 : vector<4x4xi1>, vector<4x4xf32>
      %102 = vector.shape_cast %76 : vector<4x64xf32> to vector<4x1x64xf32>
      %103 = vector.shape_cast %79 : vector<4x64xf32> to vector<1x4x64xf32>
      %104 = vector.broadcast %102 : vector<4x1x64xf32> to vector<4x4x64xf32>
      %105 = vector.broadcast %103 : vector<1x4x64xf32> to vector<4x4x64xf32>
      %106 = arith.subf %104, %105 : vector<4x4x64xf32>
      %107 = math.absf %106 : vector<4x4x64xf32>
      %cst_51 = arith.constant dense<0.000000e+00> : vector<4x4xf32>
      %108 = vector.multi_reduction <add>, %107, %cst_51 [2] : vector<4x4x64xf32> to vector<4x4xf32>
      %cst_52 = arith.constant 0.000000e+00 : f32
      %109 = arith.subf %cst_52, %4 : f32
      %110 = vector.broadcast %109 : f32 to vector<4x4xf32>
      %111 = arith.mulf %110, %108 : vector<4x4xf32>
      %cst_53 = arith.constant -1.000000e+07 : f32
      %112 = vector.broadcast %cst_53 : f32 to vector<4x4xf32>
      %113 = arith.select %96, %111, %112 : vector<4x4xi1>, vector<4x4xf32>
      %114 = arith.negf %113 : vector<4x4xf32>
      %115 = math.exp %114 : vector<4x4xf32>
      %cst_54 = arith.constant 1.000000e+00 : f32
      %116 = vector.broadcast %cst_54 : f32 to vector<4x4xf32>
      %117 = arith.addf %116, %115 : vector<4x4xf32>
      %118 = arith.divf %116, %117 : vector<4x4xf32>
      %119 = arith.mulf %101, %118 : vector<4x4xf32>
      %cst_55 = arith.constant dense<0xFF800000> : vector<4xf32>
      %120 = vector.multi_reduction <maximumf>, %119, %cst_55 [1] : vector<4x4xf32> to vector<4xf32>
      %121 = vector.shape_cast %120 : vector<4xf32> to vector<4x1xf32>
      %122 = vector.broadcast %121 : vector<4x1xf32> to vector<4x4xf32>
      %123 = arith.subf %119, %122 : vector<4x4xf32>
      %124 = math.exp %123 : vector<4x4xf32>
      %cst_56 = arith.constant dense<0.000000e+00> : vector<4xf32>
      %125 = vector.multi_reduction <add>, %124, %cst_56 [1] : vector<4x4xf32> to vector<4xf32>
      %126 = vector.shape_cast %125 : vector<4xf32> to vector<4x1xf32>
      %127 = vector.broadcast %126 : vector<4x1xf32> to vector<4x4xf32>
      %128 = arith.divf %124, %127 : vector<4x4xf32>
      %cst_57 = arith.constant dense<0.000000e+00> : vector<4x64xf32>
      %129 = tpu.matmul %128, %79, %cst_57 {dimension_numbers = #tpu.dot_dimension_numbers<[1], [0], [0], [1], [0, 0, 1, 1], [], []>} : vector<4x4xf32>, vector<4x64xf32>, vector<4x64xf32> -> vector<4x64xf32>
      %cst_58 = arith.constant dense<0xFF800000> : vector<4xf32>
      %130 = vector.multi_reduction <maximumf>, %119, %cst_58 [0] : vector<4x4xf32> to vector<4xf32>
      %131 = vector.shape_cast %130 : vector<4xf32> to vector<1x4xf32>
      %132 = vector.broadcast %131 : vector<1x4xf32> to vector<4x4xf32>
      %133 = arith.subf %119, %132 : vector<4x4xf32>
      %134 = math.exp %133 : vector<4x4xf32>
      %cst_59 = arith.constant dense<0.000000e+00> : vector<4xf32>
      %135 = vector.multi_reduction <add>, %134, %cst_59 [0] : vector<4x4xf32> to vector<4xf32>
      %136 = vector.shape_cast %135 : vector<4xf32> to vector<1x4xf32>
      %137 = vector.broadcast %136 : vector<1x4xf32> to vector<4x4xf32>
      %138 = arith.divf %134, %137 : vector<4x4xf32>
      %cst_60 = arith.constant dense<0.000000e+00> : vector<4x64xf32>
      %139 = tpu.matmul %138, %76, %cst_60 {dimension_numbers = #tpu.dot_dimension_numbers<[0], [0], [1], [1], [0, 1, 1, 1], [], []>} : vector<4x4xf32>, vector<4x64xf32>, vector<4x64xf32> -> vector<4x64xf32>
      %cst_61 = arith.constant 0.000000e+00 : f32
      %140 = vector.broadcast %cst_61 : f32 to vector<4x1xf32>
      %141 = arith.cmpf ogt, %84, %140 : vector<4x1xf32>
      %cst_62 = arith.constant 0xFF800000 : f32
      %142 = vector.shape_cast %141 : vector<4x1xi1> to vector<4x1xi1>
      %143 = vector.broadcast %142 : vector<4x1xi1> to vector<4x64xi1>
      %144 = vector.broadcast %cst_62 : f32 to vector<4x64xf32>
      %145 = arith.select %143, %129, %144 : vector<4x64xi1>, vector<4x64xf32>
      %cst_63 = arith.constant dense<0xFF800000> : vector<64xf32>
      %146 = vector.multi_reduction <maximumf>, %145, %cst_63 [0] : vector<4x64xf32> to vector<64xf32>
      %147 = vector.shape_cast %146 : vector<64xf32> to vector<1x64xf32>
      %cst_64 = arith.constant 0.000000e+00 : f32
      %148 = vector.broadcast %cst_64 : f32 to vector<4x1xf32>
      %149 = arith.cmpf ogt, %89, %148 : vector<4x1xf32>
      %cst_65 = arith.constant 0xFF800000 : f32
      %150 = vector.shape_cast %149 : vector<4x1xi1> to vector<4x1xi1>
      %151 = vector.broadcast %150 : vector<4x1xi1> to vector<4x64xi1>
      %152 = vector.broadcast %cst_65 : f32 to vector<4x64xf32>
      %153 = arith.select %151, %139, %152 : vector<4x64xi1>, vector<4x64xf32>
      %cst_66 = arith.constant dense<0xFF800000> : vector<64xf32>
      %154 = vector.multi_reduction <maximumf>, %153, %cst_66 [0] : vector<4x64xf32> to vector<64xf32>
      %155 = vector.shape_cast %154 : vector<64xf32> to vector<1x64xf32>
      %156 = arith.subf %147, %155 : vector<1x64xf32>
      %157 = arith.mulf %147, %155 : vector<1x64xf32>
      %158 = tpu.concatenate %147, %155, %156, %157 in 1 : vector<1x64xf32>, vector<1x64xf32>, vector<1x64xf32>, vector<1x64xf32> -> vector<1x256xf32>
      %159 = arith.index_cast %73 : i32 to index
      %c0_67 = arith.constant 0 : index
      %160 = vector.load %arg12[%159, %c0_67] : memref<2x256xf32, #tpu.memory_space<vmem>>, vector<1x256xf32>
      tpu.vector_store %arg12[%159, %c0_67], %158 {strides = array<i32>} : memref<2x256xf32, #tpu.memory_space<vmem>>, vector<1x256xf32>,
    }
    %c2_i32_25 = arith.constant 2 : i32
    %c0_26 = arith.constant 0 : index
    %c0_27 = arith.constant 0 : index
    %51 = vector.load %arg12[%c0_26, %c0_27] : memref<2x256xf32, #tpu.memory_space<vmem>>, vector<2x256xf32>
    %c0_28 = arith.constant 0 : index
    %c0_29 = arith.constant 0 : index
    %52 = vector.load %arg6[%c0_28, %c0_29] : memref<256x32xf32, #tpu.memory_space<vmem>>, vector<256x32xf32>
    %cst_30 = arith.constant dense<0.000000e+00> : vector<2x32xf32>
    %53 = tpu.matmul %51, %52, %cst_30 {dimension_numbers = #tpu.dot_dimension_numbers<[1], [0], [0], [1], [0, 0, 1, 1], [], []>} : vector<2x256xf32>, vector<256x32xf32>, vector<2x32xf32> -> vector<2x32xf32>
    %c0_31 = arith.constant 0 : index
    %c0_32 = arith.constant 0 : index
    %54 = vector.load %arg7[%c0_31, %c0_32] : memref<1x32xf32, #tpu.memory_space<vmem>>, vector<1x32xf32>
    %55 = vector.broadcast %54 : vector<1x32xf32> to vector<2x32xf32>
    %56 = arith.addf %53, %55 : vector<2x32xf32>
    %cst_33 = arith.constant 5.000000e-01 : f32
    %57 = vector.broadcast %cst_33 : f32 to vector<2x32xf32>
    %58 = arith.mulf %57, %56 : vector<2x32xf32>
    %cst_34 = arith.constant 0.797884583 : f32
    %59 = vector.broadcast %cst_34 : f32 to vector<2x32xf32>
    %60 = arith.mulf %56, %59 : vector<2x32xf32>
    %cst_35 = arith.constant 4.471500e-02 : f32
    %61 = vector.broadcast %cst_35 : f32 to vector<2x32xf32>
    %62 = arith.mulf %61, %56 : vector<2x32xf32>
    %63 = arith.mulf %62, %56 : vector<2x32xf32>
    %cst_36 = arith.constant 1.000000e+00 : f32
    %64 = vector.broadcast %cst_36 : f32 to vector<2x32xf32>
    %65 = arith.addf %64, %63 : vector<2x32xf32>
    %66 = arith.mulf %60, %65 : vector<2x32xf32>
    %67 = math.tanh %66 : vector<2x32xf32>
    %cst_37 = arith.constant 1.000000e+00 : f32
    %68 = vector.broadcast %cst_37 : f32 to vector<2x32xf32>
    %69 = arith.addf %68, %67 : vector<2x32xf32>
    %70 = arith.mulf %58, %69 : vector<2x32xf32>
    %c0_38 = arith.constant 0 : index
    %c0_39 = arith.constant 0 : index
    %71 = vector.load %arg9[%c0_38, %c0_39] : memref<2x32xf32, #tpu.memory_space<vmem>>, vector<2x32xf32>
    tpu.vector_store %arg9[%c0_38, %c0_39], %70 {strides = array<i32>} : memref<2x32xf32, #tpu.memory_space<vmem>>, vector<2x32xf32>,
    return
  }
  func.func @transform_0(%arg0: i32) -> (i32, i32, i32) {
    %c0_i32 = arith.constant 0 : i32
    %c0_i32_0 = arith.constant 0 : i32
    %c0_i32_1 = arith.constant 0 : i32
    return %arg0, %c0_i32, %c0_i32_0 : i32, i32, i32
  }
  func.func @transform_1(%arg0: i32) -> (i32, i32, i32) {
    %c0_i32 = arith.constant 0 : i32
    %c0_i32_0 = arith.constant 0 : i32
    %c0_i32_1 = arith.constant 0 : i32
    return %arg0, %c0_i32, %c0_i32_0 : i32, i32, i32
  }
  func.func @transform_2(%arg0: i32) -> (i32, i32) {
    %c0_i32 = arith.constant 0 : i32
    %c0_i32_0 = arith.constant 0 : i32
    %c0_i32_1 = arith.constant 0 : i32
    return %c0_i32, %c0_i32_0 : i32, i32
  }
  func.func @transform_3(%arg0: i32) -> (i32, i32) {
    %c0_i32 = arith.constant 0 : i32
    %c0_i32_0 = arith.constant 0 : i32
    %c0_i32_1 = arith.constant 0 : i32
    return %c0_i32, %c0_i32_0 : i32, i32
  }
  func.func @transform_4(%arg0: i32) -> (i32, i32) {
    %c0_i32 = arith.constant 0 : i32
    %c0_i32_0 = arith.constant 0 : i32
    %c0_i32_1 = arith.constant 0 : i32
    return %c0_i32, %c0_i32_0 : i32, i32
  }
  func.func @transform_5(%arg0: i32) -> (i32, i32) {
    %c0_i32 = arith.constant 0 : i32
    %c0_i32_0 = arith.constant 0 : i32
    %c0_i32_1 = arith.constant 0 : i32
    return %c0_i32, %c0_i32_0 : i32, i32
  }
  func.func @transform_6(%arg0: i32) -> (i32, i32) {
    %c0_i32 = arith.constant 0 : i32
    %c0_i32_0 = arith.constant 0 : i32
    %c0_i32_1 = arith.constant 0 : i32
    return %c0_i32, %c0_i32_0 : i32, i32
  }
  func.func @transform_7(%arg0: i32) -> (i32, i32) {
    %c0_i32 = arith.constant 0 : i32
    %c0_i32_0 = arith.constant 0 : i32
    %c0_i32_1 = arith.constant 0 : i32
    return %c0_i32, %c0_i32_0 : i32, i32
  }
  func.func @transform_8(%arg0: i32) -> (i32, i32) {
    %c0_i32 = arith.constant 0 : i32
    %c0_i32_0 = arith.constant 0 : i32
    return %arg0, %c0_i32 : i32, i32
  }
}

</mosaic_0001>

<bundles_post_ra>
// kernel: tpu_custom_call.1
= control target key start
LH: loop header
LB: loop body
LE: loop exit
PB: predicated region body
PF: predicated region fallthrough
CT: control target
= control target key end

     0   :  { %13 = vsyncpa [#allocation7], 0  ;;  %s2591_s0 = inlined_call_operand.vmem [shape: f32[2,32,64], index: 0, kind: input, shape index: {}]   ;;  %s2592_s1 = inlined_call_operand.vmem [shape: f32[2,32,64], index: 1, kind: input, shape index: {}]   ;;  %s2593_s2 = inlined_call_operand.vmem [shape: f32[64,32], index: 2, kind: input, shape index: {}]   ;;  %s2594_s3 = inlined_call_operand.vmem [shape: f32[1,32], index: 3, kind: input, shape index: {}]   ;;  %s2595_s4 = inlined_call_operand.vmem [shape: f32[1,32], index: 4, kind: input, shape index: {}]   ;;  %s2596_s5 = inlined_call_operand.vmem [shape: f32[256,32], index: 5, kind: input, shape index: {}]   ;;  %s2597_s6 = inlined_call_operand.vmem [shape: f32[1,32], index: 6, kind: input, shape index: {}]   ;;  %s2598_s7 = inlined_call_operand.vmem [shape: f32[1,2], index: 7, kind: input, shape index: {}]   ;;  %s2599_s8 = inlined_call_operand.hbm [shape: f32[2,32], index: 8, kind: output, shape index: {}]  }
   0x1   :  { %14 = vsyncpa [#allocation6], 0  ;;  %s34_s29 = sshll.u32 %s2598_s7, 4  ;;  %s1639_s30 = smov [#allocation5]   ;;  %s35_s29 = int_to_ptr.vmem [resolvable:$true] %s34_s29 }
   0x2   :  { %37 = dma.vmem_to_smem %s35_s29, 16, %s1639_s30, [#allocation7]  }
   0x3   :  { %1631 = dma.done.wait [#allocation7], 16  }
   0x4   :  { %1632 = vsyncadd [#allocation7], 4294967280 }
   0x5   :  { %42 = sfence }
   0x6   :  { %v50_v0 = vld [vmem:[%s2593_s2 + $0x38] sm:$0xff]  ;;  %s1695_s11 = sld [smem:[#allocation5]]  ;;  %v49_v1 = vld [vmem:[%s2593_s2 + $0x30] sm:$0xff]  ;;  %v48_v2 = vld [vmem:[%s2593_s2 + $0x28] sm:$0xff]  ;;  %vm74_vm0 = vcmask 523264   ;;  %vm223_vm1 = vcmask 261120  }
   0x7   :  { %s1700_s14 = sld [smem:[#allocation5 + $0x1]]  ;;  %131 = vmatpush.msra.mxu0 %v50_v0  ;;  %1428 = vmatpush.msra.mxu1 %v50_v0  ;;  %v47_v3 = vld [vmem:[%s2593_s2 + $0x20] sm:$0xff]  ;;  %v46_v4 = vld [vmem:[%s2593_s2 + $0x18] sm:$0xff]  ;;  %v45_v5 = vld [vmem:[%s2593_s2 + $0x10] sm:$0xff] }
   0x8   :  { %1429 = vmatpush.msra.mxu2 %v50_v0  ;;  %1430 = vmatpush.msra.mxu3 %v50_v0  ;;  %v44_v6 = vld [vmem:[%s2593_s2 + $0x8] sm:$0xff]  ;;  %v43_v7 = vld [vmem:[%s2593_s2] sm:$0xff]  ;;  %v57_v16 = vld [vmem:[%s2591_s0 + $0x10] sm:$0xff] }
   0x9   :  { %132 = vmatpush.msra.mxu0 %v49_v1  ;;  %1431 = vmatpush.msra.mxu1 %v49_v1  ;;  %v1723_v8 = vld [vmem:[%s2591_s0] sm:$0xff]  ;;  %v56_v12 = vld [vmem:[%s2591_s0 + $0x8] sm:$0xff]  ;;  %v61_v17 = vld [vmem:[%s2591_s0 + $0x30] sm:$0xff] }
   0xa   :  { %1432 = vmatpush.msra.mxu2 %v49_v1  ;;  %1433 = vmatpush.msra.mxu3 %v49_v1  ;;  %v1728_v9 = vld [vmem:[%s2591_s0 + $0x20] sm:$0xff]  ;;  %v1754_v13 = vld [vmem:[%s2591_s0 + $0x28] sm:$0xff]  ;;  %v65_v18 = vld [vmem:[%s2592_s1 + $0x10] sm:$0xff] }
   0xb   :  { %133 = vmatpush.msra.mxu0 %v48_v2  ;;  %1434 = vmatpush.msra.mxu1 %v48_v2  ;;  %v1733_v10 = vld [vmem:[%s2592_s1] sm:$0xff]  ;;  %v64_v14 = vld [vmem:[%s2592_s1 + $0x8] sm:$0xff]  ;;  %v69_v19 = vld [vmem:[%s2592_s1 + $0x30] sm:$0xff] }
   0xc   :  { %1435 = vmatpush.msra.mxu2 %v48_v2  ;;  %1436 = vmatpush.msra.mxu3 %v48_v2  ;;  %v1738_v11 = vld [vmem:[%s2592_s1 + $0x20] sm:$0xff]  ;;  %v68_v15 = vld [vmem:[%s2592_s1 + $0x28] sm:$0xff]  ;;  %v58_v20 = vld [vmem:[%s2591_s0 + $0x18] sm:$0xff] }
   0xd   :  { %134 = vmatpush.msra.mxu0 %v47_v3  ;;  %1437 = vmatpush.msra.mxu1 %v47_v3  ;;  %v62_v21 = vld [vmem:[%s2591_s0 + $0x38] sm:$0xff]  ;;  %v1802_v24 = vld [vmem:[%s2594_s3] ss:$0 sm:$0xff] }
   0xe   :  { %1438 = vmatpush.msra.mxu2 %v47_v3  ;;  %1439 = vmatpush.msra.mxu3 %v47_v3  ;;  %v66_v22 = vld [vmem:[%s2592_s1 + $0x18] sm:$0xff]  ;;  %v1809_v29 = vld [vmem:[%s2595_s4] ss:$0 sm:$0xff] }
   0xf   :  { %135 = vmatpush.msra.mxu0 %v46_v4  ;;  %1440 = vmatpush.msra.mxu1 %v46_v4  ;;  %v70_v23 = vld [vmem:[%s2592_s1 + $0x38] sm:$0xff] }
  0x10   :  { %1441 = vmatpush.msra.mxu2 %v46_v4  ;;  %1442 = vmatpush.msra.mxu3 %v46_v4 }
  0x11   :  { %136 = vmatpush.msra.mxu0 %v45_v5  ;;  %1443 = vmatpush.msra.mxu1 %v45_v5 }
  0x12   :  { %1444 = vmatpush.msra.mxu2 %v45_v5  ;;  %1445 = vmatpush.msra.mxu3 %v45_v5 }
  0x13   :  { %137 = vmatpush.msra.mxu0 %v44_v6  ;;  %1446 = vmatpush.msra.mxu1 %v44_v6 }
  0x14   :  { %1447 = vmatpush.msra.mxu2 %v44_v6  ;;  %1448 = vmatpush.msra.mxu3 %v44_v6 }
  0x15   :  { %138 = vmatpush.msra.mxu0 %v43_v7  ;;  %1449 = vmatpush.msra.mxu1 %v43_v7 }
  0x16   :  { %1450 = vmatpush.msra.mxu2 %v43_v7  ;;  %1451 = vmatpush.msra.mxu3 %v43_v7 }
  0x17   :  { %1397 = vmatmul.msk.f32.vlgmr.msra.gmra.mxu0 %vm74_vm0, %v1723_v8  ;;  %1401 = vmatmul.msk.f32.vlgmr.msra.gmra.mxu1 %vm74_vm0, %v1728_v9 }
  0x18   :  { %1405 = vmatmul.msk.f32.vlgmr.msra.gmra.mxu2 %vm74_vm0, %v1733_v10  ;;  %1409 = vmatmul.msk.f32.vlgmr.msra.gmra.mxu3 %vm74_vm0, %v1738_v11 }
  0x1f   :  { %1398 = vmatmul.msk.f32.gmra.mxu0 %vm74_vm0, %v56_v12  ;;  %1402 = vmatmul.msk.f32.gmra.mxu1 %vm74_vm0, %v1754_v13 }
  0x20   :  { %1406 = vmatmul.msk.f32.gmra.mxu2 %vm74_vm0, %v64_v14  ;;  %1410 = vmatmul.msk.f32.gmra.mxu3 %vm74_vm0, %v68_v15 }
  0x27   :  { %1399 = vmatmul.msk.f32.gmra.mxu0 %vm74_vm0, %v57_v16  ;;  %1403 = vmatmul.msk.f32.gmra.mxu1 %vm74_vm0, %v61_v17 }
  0x28   :  { %1407 = vmatmul.msk.f32.gmra.mxu2 %vm74_vm0, %v65_v18  ;;  %1411 = vmatmul.msk.f32.gmra.mxu3 %vm74_vm0, %v69_v19 }
  0x2f   :  { %1400 = vmatmul.msk.f32.gmra.mxu0 %vm74_vm0, %v58_v20  ;;  %1404 = vmatmul.msk.f32.gmra.mxu1 %vm74_vm0, %v62_v21 }
  0x30   :  { %1408 = vmatmul.msk.f32.gmra.mxu2 %vm74_vm0, %v66_v22  ;;  %1412 = vmatmul.msk.f32.gmra.mxu3 %vm74_vm0, %v70_v23 }
  0x94   :  { %v140_v25 = vpop.f32.mrf.mxu0  ;;  %v152_v26 = vpop.f32.mrf.mxu1 }
  0x95   :  { %v141_v27 = vadd.f32 %v1802_v24, %v140_v25  ;;  %v153_v28 = vadd.f32 %v1802_v24, %v152_v26 }
  0x97   :  { %1467 = vtanh.f32 %v141_v27 }
  0x98   :  { %1469 = vtanh.f32 %v153_v28 }
  0x9b   :  { %v164_v30 = vpop.f32.mrf.mxu2  ;;  %v176_v31 = vpop.f32.mrf.mxu3 }
  0x9c   :  { %v165_v32 = vadd.f32 %v1802_v24, %v164_v30  ;;  %v177_v33 = vadd.f32 %v1802_v24, %v176_v31  ;;  %v143_v34 = vpop.f32.mrf.mxu0  ;;  %v155_v35 = vpop.f32.mrf.mxu1 }
  0x9d   :  { %v1468_v36 = vpop.eup %1467  ;;  %v144_v37 = vadd.f32 %v1802_v24, %v143_v34  ;;  %v156_v38 = vadd.f32 %v1802_v24, %v155_v35 }
  0x9e   :  { %v1470_v39 = vpop.eup %1469  ;;  %1471 = vtanh.f32 %v165_v32  ;;  %v207_v40 = vmul.f32 %v1468_v36, %v1809_v29 }
  0x9f   :  { %1473 = vtanh.f32 %v177_v33  ;;  %v211_v41 = vmul.f32 %v1470_v39, %v1809_v29 }
  0xa0   :  { %v224_v42 = vsel %vm223_vm1, %v207_v40, 0.0  ;;  %1475 = vtanh.f32 %v144_v37 }
  0xa1   :  { %v236_v43 = vsel %vm223_vm1, %v211_v41, 0.0  ;;  %225 = vadd.xlane.f32.xlu0 %v224_v42  ;;  %1477 = vtanh.f32 %v156_v38 }
  0xa2   :  { %237 = vadd.xlane.f32.xlu2 %v236_v43 }
  0xa3   :  { %v167_v44 = vpop.f32.mrf.mxu2  ;;  %v179_v45 = vpop.f32.mrf.mxu3 }
  0xa4   :  { %v1472_v46 = vpop.eup %1471  ;;  %v180_v47 = vadd.f32 %v1802_v24, %v179_v45  ;;  %v146_v48 = vpop.f32.mrf.mxu0  ;;  %v168_v55 = vadd.f32 %v1802_v24, %v167_v44 }
  0xa5   :  { %v158_v49 = vpop.f32.mrf.mxu1  ;;  %v1474_v50 = vpop.eup %1473  ;;  %v215_v51 = vmul.f32 %v1472_v46, %v1809_v29  ;;  %v147_v52 = vadd.f32 %v1802_v24, %v146_v48 }
  0xa6   :  { %v159_v53 = vadd.f32 %v1802_v24, %v158_v49  ;;  %v1476_v54 = vpop.eup %1475  ;;  %v219_v56 = vmul.f32 %v1474_v50, %v1809_v29  ;;  %1479 = vtanh.f32 %v180_v47 }
  0xa7   :  { %v1478_v57 = vpop.eup %1477  ;;  %v248_v58 = vsel %vm223_vm1, %v215_v51, 0.0  ;;  %1481 = vtanh.f32 %v147_v52  ;;  %v208_v61 = vmul.f32 %v1476_v54, %v1809_v29 }
  0xa8   :  { %249 = vadd.xlane.f32.xlu1 %v248_v58  ;;  %v260_v59 = vsel %vm223_vm1, %v219_v56, 0.0  ;;  %1483 = vtanh.f32 %v159_v53  ;;  %v212_v60 = vmul.f32 %v1478_v57, %v1809_v29 }
  0xa9   :  { %261 = vadd.xlane.f32.xlu0 %v260_v59  ;;  %1485 = vtanh.f32 %v168_v55  ;;  %v227_v6 = vsel %vm223_vm1, %v208_v61, 0.0 }
  0xaa   :  { %v239_v2 = vsel %vm223_vm1, %v212_v60, 0.0 }
  0xab   :  { %v170_v62 = vpop.f32.mrf.mxu2  ;;  %v182_v63 = vpop.f32.mrf.mxu3 }
  0xac   :  { %v149_v0 = vpop.f32.mrf.mxu0  ;;  %v1480_v1 = vpop.eup %1479  ;;  %v171_v12 = vadd.f32 %v1802_v24, %v170_v62  ;;  %v183_v26 = vadd.f32 %v1802_v24, %v182_v63 }
  0xad   :  { %v150_v3 = vadd.f32 %v1802_v24, %v149_v0  ;;  %v1482_v4 = vpop.eup %1481  ;;  %v220_v5 = vmul.f32 %v1480_v1, %v1809_v29  ;;  %v161_v16 = vpop.f32.mrf.mxu1 }
  0xae   :  { %v1484_v7 = vpop.eup %1483  ;;  %v209_v17 = vmul.f32 %v1482_v4, %v1809_v29  ;;  %v162_v23 = vadd.f32 %v1802_v24, %v161_v16 }
  0xaf   :  { %v1486_v14 = vpop.eup %1485  ;;  %v263_v15 = vsel %vm223_vm1, %v220_v5, 0.0  ;;  %1487 = vtanh.f32 %v150_v3  ;;  %v213_v18 = vmul.f32 %v1484_v7, %v1809_v29 }
  0xb0   :  { %240 = vadd.xlane.f32.xlu1 %v239_v2  ;;  %264 = vadd.xlane.f32.xlu2 %v263_v15  ;;  %1489 = vtanh.f32 %v171_v12  ;;  %v216_v20 = vmul.f32 %v1486_v14, %v1809_v29  ;;  %v230_v27 = vsel %vm223_vm1, %v209_v17, 0.0 }
  0xb1   :  { %228 = vadd.xlane.f32.xlu0 %v227_v6  ;;  %v242_v28 = vsel %vm223_vm1, %v213_v18, 0.0 }
  0xb2   :  { %v251_v31 = vsel %vm223_vm1, %v216_v20, 0.0 }
  0xb3   :  { %v173_v19 = vpop.f32.mrf.mxu2  ;;  %v185_v21 = vpop.f32.mrf.mxu3 }
  0xb4   :  { %v174_v22 = vadd.f32 %v1802_v24, %v173_v19  ;;  %v186_v25 = vadd.f32 %v1802_v24, %v185_v21 }
  0xb5   :  { %v1488_v30 = vpop.eup %1487 }
  0xb6   :  { %1491 = vtanh.f32 %v174_v22  ;;  %v1490_v32 = vpop.eup %1489  ;;  %v210_v33 = vmul.f32 %v1488_v30, %v1809_v29 }
  0xb7   :  { %1493 = vtanh.f32 %v162_v23  ;;  %v217_v35 = vmul.f32 %v1490_v32, %v1809_v29 }
  0xb8   :  { %252 = vadd.xlane.f32.xlu1 %v251_v31  ;;  %231 = vadd.xlane.f32.xlu2 %v230_v27  ;;  %1495 = vtanh.f32 %v186_v25  ;;  %v233_v37 = vsel %vm223_vm1, %v210_v33, 0.0 }
  0xb9   :  { %243 = vadd.xlane.f32.xlu0 %v242_v28  ;;  %1497 = vtanh.f32 %v183_v26  ;;  %v254_v41 = vsel %vm223_vm1, %v217_v35, 0.0 }
  0xbc   :  { %v1492_v34 = vpop.eup %1491 }
  0xbd   :  { %v218_v24 = vmul.f32 %v1492_v34, %v1809_v29  ;;  %v1494_v36 = vpop.eup %1493 }
  0xbe   :  { %v1496_v38 = vpop.eup %1495  ;;  %v214_v42 = vmul.f32 %v1494_v36, %v1809_v29 }
  0xbf   :  { %v257_v39 = vsel %vm223_vm1, %v218_v24, 0.0  ;;  %v1498_v40 = vpop.eup %1497  ;;  %v222_v43 = vmul.f32 %v1496_v38, %v1809_v29 }
  0xc0   :  { %258 = vadd.xlane.f32.xlu1 %v257_v39  ;;  %255 = vadd.xlane.f32.xlu2 %v254_v41  ;;  %v221_v44 = vmul.f32 %v1498_v40, %v1809_v29  ;;  %v245_v45 = vsel %vm223_vm1, %v214_v42, 0.0 }
  0xc1   :  { %234 = vadd.xlane.f32.xlu0 %v233_v37  ;;  %v269_v46 = vsel %vm223_vm1, %v222_v43, 0.0 }
  0xc2   :  { %v266_v47 = vsel %vm223_vm1, %v221_v44, 0.0 }
  0xc8   :  { %267 = vadd.xlane.f32.xlu1 %v266_v47  ;;  %246 = vadd.xlane.f32.xlu2 %v245_v45 }
  0xc9   :  { %270 = vadd.xlane.f32.xlu0 %v269_v46 }
 0x114   :  { %v226_v48 = vpop.xlane.xlu0 %225 }
 0x115   :  { %v238_v49 = vpop.xlane.xlu2 %237  ;;  %v272_v50 = vrot.slane %v226_v48, 4 }
 0x116   :  { %v296_v51 = vrot.slane %v238_v49, 4 }
 0x117   :  { %v273_v52 = vmax.f32 %v226_v48, %v272_v50 }
 0x118   :  { %v297_v53 = vmax.f32 %v238_v49, %v296_v51 }
 0x119   :  { %v274_v54 = vrot.slane %v273_v52, 2 }
 0x11a   :  { %v298_v55 = vrot.slane %v297_v53, 2 }
 0x11b   :  { %v275_v56 = vmax.f32 %v273_v52, %v274_v54  ;;  %v250_v57 = vpop.xlane.xlu1 %249 }
 0x11c   :  { %v299_v29 = vmax.f32 %v297_v53, %v298_v55  ;;  %v600_v58 = vrot.slane %v250_v57, 4  ;;  %v262_v59 = vpop.xlane.xlu0 %261 }
 0x11d   :  { %v276_v60 = vrot.slane %v275_v56, 1  ;;  %v624_v61 = vrot.slane %v262_v59, 4 }
 0x11e   :  { %v300_v62 = vrot.slane %v299_v29, 1  ;;  %v601_v63 = vmax.f32 %v250_v57, %v600_v58 }
 0x11f   :  { %v277_v0 = vmax.f32 %v275_v56, %v276_v60  ;;  %v625_v1 = vmax.f32 %v262_v59, %v624_v61 }
 0x120   :  { %v301_v2 = vmax.f32 %v299_v29, %v300_v62  ;;  %v602_v3 = vrot.slane %v601_v63, 2 }
 0x121   :  { %v320_v4 = vsub.f32 %v226_v48, %v277_v0  ;;  %v626_v5 = vrot.slane %v625_v1, 2 }
 0x122   :  { %v324_v6 = vsub.f32 %v238_v49, %v301_v2  ;;  %v603_v7 = vmax.f32 %v601_v63, %v602_v3 }
 0x123   :  { %v328_v12 = vmul.f32 1.442695, %v320_v4  ;;  %v627_v14 = vmax.f32 %v625_v1, %v626_v5  ;;  %v241_v15 = vpop.xlane.xlu1 %240  ;;  %v1857_v19 = vpop.xlane.xlu2 %264 }
 0x124   :  { %v336_v16 = vmul.f32 1.442695, %v324_v6  ;;  %v604_v17 = vrot.slane %v603_v7, 1  ;;  %v302_v18 = vrot.slane %v241_v15, 4  ;;  %v1859_v20 = vpop.xlane.xlu0 %228  ;;  %v630_v22 = vrot.slane %v1857_v19, 4 }
 0x125   :  { %1499 = vpow2.f32 %v328_v12  ;;  %v628_v21 = vrot.slane %v627_v14, 1  ;;  %v278_v23 = vrot.slane %v1859_v20, 4 }
 0x126   :  { %1501 = vpow2.f32 %v336_v16  ;;  %v605_v25 = vmax.f32 %v603_v7, %v604_v17  ;;  %v303_v26 = vmax.f32 %v241_v15, %v302_v18  ;;  %v631_v28 = vmax.f32 %v1857_v19, %v630_v22 }
 0x127   :  { %v629_v27 = vmax.f32 %v627_v14, %v628_v21  ;;  %v279_v30 = vmax.f32 %v1859_v20, %v278_v23 }
 0x128   :  { %v648_v31 = vsub.f32 %v250_v57, %v605_v25  ;;  %v304_v32 = vrot.slane %v303_v26, 2  ;;  %v632_v36 = vrot.slane %v631_v28, 2 }
 0x129   :  { %v652_v33 = vsub.f32 %v262_v59, %v629_v27  ;;  %v280_v34 = vrot.slane %v279_v30, 2 }
 0x12a   :  { %v656_v35 = vmul.f32 1.442695, %v648_v31  ;;  %v305_v24 = vmax.f32 %v303_v26, %v304_v32  ;;  %v633_v46 = vmax.f32 %v631_v28, %v632_v36 }
 0x12b   :  { %v1865_v37 = vpop.eup %1499  ;;  %v664_v38 = vmul.f32 1.442695, %v652_v33  ;;  %v281_v39 = vmax.f32 %v279_v30, %v280_v34  ;;  %v1873_v49 = vpop.xlane.xlu1 %252 }
 0x12c   :  { %v1867_v40 = vpop.eup %1501  ;;  %v344_v41 = vrot.slane %v1865_v37, 4  ;;  %1503 = vpow2.f32 %v656_v35  ;;  %v306_v42 = vrot.slane %v305_v24, 1  ;;  %v634_v56 = vrot.slane %v633_v46, 1 }
 0x12d   :  { %v368_v43 = vrot.slane %v1867_v40, 4  ;;  %1505 = vpow2.f32 %v664_v38  ;;  %v282_v48 = vrot.slane %v281_v39, 1  ;;  %v606_v57 = vrot.slane %v1873_v49, 4 }
 0x12e   :  { %v345_v44 = vadd.f32 %v1865_v37, %v344_v41  ;;  %v307_v45 = vmax.f32 %v305_v24, %v306_v42  ;;  %v635_v1 = vmax.f32 %v633_v46, %v634_v56 }
 0x12f   :  { %v369_v47 = vadd.f32 %v1867_v40, %v368_v43  ;;  %v283_v59 = vmax.f32 %v281_v39, %v282_v48  ;;  %v607_v2 = vmax.f32 %v1873_v49, %v606_v57 }
 0x130   :  { %v346_v50 = vrot.slane %v345_v44, 2  ;;  %v325_v51 = vsub.f32 %v241_v15, %v307_v45  ;;  %v653_v12 = vsub.f32 %v1857_v19, %v635_v1  ;;  %v1894_v15 = vpop.xlane.xlu2 %231 }
 0x131   :  { %v370_v52 = vrot.slane %v369_v47, 2  ;;  %v321_v6 = vsub.f32 %v1859_v20, %v283_v59  ;;  %v608_v14 = vrot.slane %v607_v2, 2  ;;  %v284_v22 = vrot.slane %v1894_v15, 4 }
 0x132   :  { %v1875_v53 = vpop.eup %1503  ;;  %v347_v54 = vadd.f32 %v346_v50, %v345_v44  ;;  %v338_v55 = vmul.f32 1.442695, %v325_v51  ;;  %v666_v23 = vmul.f32 1.442695, %v653_v12 }
 0x133   :  { %v371_v29 = vadd.f32 %v370_v52, %v369_v47  ;;  %v672_v58 = vrot.slane %v1875_v53, 4  ;;  %v1879_v60 = vpop.eup %1505  ;;  %v330_v18 = vmul.f32 1.442695, %v321_v6  ;;  %v609_v25 = vmax.f32 %v607_v2, %v608_v14  ;;  %v1938_v6 = vpop.xlane.xlu0 %243 }
 0x134   :  { %v348_v61 = vrot.slane %v347_v54, 1  ;;  %1507 = vpow2.f32 %v338_v55  ;;  %v696_v5 = vrot.slane %v1879_v60, 4  ;;  %v285_v32 = vmax.f32 %v1894_v15, %v284_v22 }
 0x135   :  { %v372_v62 = vrot.slane %v371_v29, 1  ;;  %v673_v63 = vadd.f32 %v1875_v53, %v672_v58  ;;  %v610_v34 = vrot.slane %v609_v25, 1 }
 0x136   :  { %v1882_v0 = vadd.f32 %v348_v61, %v347_v54  ;;  %v697_v17 = vadd.f32 %v1879_v60, %v696_v5  ;;  %v286_v41 = vrot.slane %v285_v32, 2 }
 0x137   :  { %v1885_v3 = vadd.f32 %v372_v62, %v371_v29  ;;  %v674_v4 = vrot.slane %v673_v63, 2  ;;  %v611_v43 = vmax.f32 %v609_v25, %v610_v34 }
 0x138   :  { %1509 = vrcp.f32 %v1882_v0  ;;  %v698_v19 = vrot.slane %v697_v17, 2  ;;  %v287_v50 = vmax.f32 %v285_v32, %v286_v41  ;;  %v403_v54 = vand.u32 2147483648, %v1882_v0 }
 0x139   :  { %1511 = vrcp.f32 %v1885_v3  ;;  %v675_v16 = vadd.f32 %v674_v4, %v673_v63  ;;  %v649_v52 = vsub.f32 %v1873_v49, %v611_v43  ;;  %vm397_vm3 = vweird.f32 %v1882_v0 }
 0x13a   :  { %v1891_v7 = vpop.eup %1507  ;;  %1513 = vpow2.f32 %v330_v18  ;;  %v699_v24 = vadd.f32 %v698_v19, %v697_v17  ;;  %v401_v57 = vand.u32 2147483647, %v1882_v0  ;;  %v288_v62 = vrot.slane %v287_v50, 1 }
 0x13b   :  { %v374_v21 = vrot.slane %v1891_v7, 4  ;;  %v676_v28 = vrot.slane %v675_v16, 1  ;;  %1515 = vpow2.f32 %v666_v23  ;;  %vm457_vm6 = vweird.f32 %v1885_v3 }
 0x13c   :  { %v700_v44 = vrot.slane %v699_v24, 1  ;;  %v463_v63 = vand.u32 2147483648, %v1885_v3  ;;  %v658_v1 = vmul.f32 1.442695, %v649_v52  ;;  %v461_v2 = vand.u32 2147483647, %v1885_v3 }
 0x13d   :  { %v375_v31 = vadd.f32 %v1891_v7, %v374_v21  ;;  %v1906_v35 = vadd.f32 %v676_v28, %v675_v16  ;;  %v404_v4 = vor.u32 1.1754944e-38, %v403_v54  ;;  %vm402_vm8 = vcmp.eq.f32.partialorder %v401_v57, 8.507059e+37 }
 0x13e   :  { %v1510_v20 = vpop.eup %1509  ;;  %v1917_v55 = vadd.f32 %v700_v44, %v699_v24  ;;  %v464_v21 = vor.u32 1.1754944e-38, %v463_v63  ;;  %vm462_vm9 = vcmp.eq.f32.partialorder %v461_v2, 8.507059e+37 }
 0x13f   :  { %v1899_v26 = vpop.eup %1511  ;;  %v393_v27 = vmul.f32 %v1510_v20, %v1882_v0  ;;  %v376_v39 = vrot.slane %v375_v31, 2  ;;  %1517 = vrcp.f32 %v1906_v35  ;;  %vm398_vm2 = vweird.f32 %v1510_v20 }
 0x140   :  { %v453_v30 = vmul.f32 %v1899_v26, %v1885_v3  ;;  %v1908_v36 = vpop.eup %1513  ;;  %vm458_vm4 = vweird.f32 %v1899_v26  ;;  %vm1927_vm5 = vmor %vm397_vm3, %vm398_vm2  ;;  %1519 = vrcp.f32 %v1917_v55  ;;  %v308_v3 = vrot.slane %v1938_v6, 4 }
 0x141   :  { %v394_v33 = vsub.f32 1.0, %v393_v27  ;;  %v1911_v45 = vpop.eup %1515  ;;  %v350_v46 = vrot.slane %v1908_v36, 4  ;;  %v377_v48 = vadd.f32 %v376_v39, %v375_v31  ;;  %vm459_vm7 = vmor %vm457_vm6, %vm458_vm4  ;;  %1521 = vpow2.f32 %v658_v1 }
 0x142   :  { %v454_v38 = vsub.f32 1.0, %v453_v30  ;;  %v702_v56 = vrot.slane %v1911_v45, 4  ;;  %v729_v39 = vand.u32 2147483647, %v1906_v35  ;;  %v731_v41 = vand.u32 2147483648, %v1906_v35 }
 0x143   :  { %v395_v42 = vmul.f32 %v1510_v20, %v394_v33  ;;  %v351_v29 = vadd.f32 %v1908_v36, %v350_v46  ;;  %v378_v61 = vrot.slane %v377_v48, 1  ;;  %vm725_vm11 = vweird.f32 %v1906_v35 }
 0x144   :  { %v455_v47 = vmul.f32 %v1899_v26, %v454_v38  ;;  %v703_v5 = vadd.f32 %v1911_v45, %v702_v56  ;;  %vm1971_vm12 = vcmp.eq.f32.partialorder %v729_v39, 8.507059e+37  ;;  %v732_v52 = vor.u32 1.1754944e-38, %v731_v41  ;;  %v1979_v56 = vpop.xlane.xlu1 %258 }
 0x145   :  { %v396_v51 = vadd.f32 %v1510_v20, %v395_v42  ;;  %v1923_v58 = vpop.eup %1517  ;;  %v352_v14 = vrot.slane %v351_v29, 2  ;;  %v1943_v18 = vadd.f32 %v378_v61, %v377_v48  ;;  %vm785_vm13 = vweird.f32 %v1917_v55 }
 0x146   :  { %v456_v59 = vadd.f32 %v1899_v26, %v455_v47  ;;  %v721_v12 = vmul.f32 %v1923_v58, %v1906_v35  ;;  %v704_v22 = vrot.slane %v703_v5, 2  ;;  %v1947_v19 = vpop.eup %1519  ;;  %vm726_vm10 = vweird.f32 %v1923_v58 }
 0x147   :  { %v400_v0 = vsel %vm1927_vm5, %v1510_v20, %v396_v51  ;;  %v289_v20 = vmax.f32 %v287_v50, %v288_v62  ;;  %v353_v28 = vadd.f32 %v352_v14, %v351_v29  ;;  %1523 = vrcp.f32 %v1943_v18  ;;  %v1953_v33 = vpop.eup %1521  ;;  %vm1984_vm14 = vmor %vm725_vm11, %vm726_vm10 }
 0x148   :  { %v460_v16 = vsel %vm459_vm7, %v1899_v26, %v456_v59  ;;  %v405_v17 = vsel %vm402_vm8, %v404_v4, %v400_v0  ;;  %v722_v27 = vsub.f32 1.0, %v721_v12  ;;  %v309_v26 = vmax.f32 %v1938_v6, %v308_v3  ;;  %v2000_v4 = vpop.xlane.xlu2 %255 }
 0x149   :  { %v465_v23 = vsel %vm462_vm9, %v464_v21, %v460_v16  ;;  %v406_v25 = vmul.f32 %v1865_v37, %v405_v17  ;;  %v705_v31 = vadd.f32 %v704_v22, %v703_v5  ;;  %v322_v32 = vsub.f32 %v1894_v15, %v289_v20 }
 0x14a   :  { %v466_v30 = vmul.f32 %v1867_v40, %v465_v23  ;;  %v723_v24 = vmul.f32 %v1923_v58, %v722_v27  ;;  %v781_v37 = vmul.f32 %v1947_v19, %v1917_v55  ;;  %v354_v38 = vrot.slane %v353_v28, 1 }
 0x14b   :  { %v512_v34 = vmul.f32 %v406_v25, %v1723_v8  ;;  %v310_v40 = vrot.slane %v309_v26, 2  ;;  %v706_v43 = vrot.slane %v705_v31, 1  ;;  %v678_v8 = vrot.slane %v1953_v33, 4 }
 0x14c   :  { %v516_v15 = vmul.f32 %v466_v30, %v1728_v9  ;;  %v332_v44 = vmul.f32 1.442695, %v322_v32  ;;  %v724_v47 = vadd.f32 %v1923_v58, %v723_v24  ;;  %v782_v48 = vsub.f32 1.0, %v781_v37 }
 0x14d   :  { %v1962_v42 = vpop.eup %1523  ;;  %v520_v46 = vsel %vm74_vm0, %v512_v34, 0.0  ;;  %v1968_v50 = vadd.f32 %v354_v38, %v353_v28  ;;  %v789_v9 = vand.u32 2147483647, %v1917_v55  ;;  %v1988_v59 = vadd.f32 %v706_v43, %v705_v31 }
 0x14e   :  { %1525 = vpow2.f32 %v332_v44  ;;  %v468_v54 = vmul.f32 %v1962_v42, %v1943_v18  ;;  %v548_v57 = vsel %vm74_vm0, %v516_v15, 0.0  ;;  %v521_v29 = vrot.slane %v520_v46, 4 }
 0x14f   :  { %v679_v49 = vadd.f32 %v1953_v33, %v678_v8  ;;  %v728_v61 = vsel %vm1984_vm14, %v1923_v58, %v724_v47  ;;  %v783_v62 = vmul.f32 %v1947_v19, %v782_v48  ;;  %1527 = vrcp.f32 %v1968_v50 }
 0x150   :  { %v311_v63 = vmax.f32 %v309_v26, %v310_v40  ;;  %vm786_vm15 = vweird.f32 %v1947_v19  ;;  %v791_v0 = vand.u32 2147483648, %v1917_v55  ;;  %v476_v1 = vand.u32 2147483647, %v1943_v18 }
 0x151   :  { %v618_v2 = vrot.slane %v1979_v56, 4  ;;  %v549_v5 = vrot.slane %v548_v57, 4  ;;  %vm2002_vm1 = vcmp.eq.f32.partialorder %v789_v9, 8.507059e+37  ;;  %v469_v58 = vsub.f32 1.0, %v468_v54  ;;  %vm2026_vm3 = vmor %vm785_vm13, %vm786_vm15  ;;  %v2048_v54 = vpop.xlane.xlu0 %234 }
 0x152   :  { %v478_v14 = vand.u32 2147483648, %v1943_v18  ;;  %v312_v16 = vrot.slane %v311_v63, 1  ;;  %v733_v21 = vsel %vm1971_vm12, %v732_v52, %v728_v61  ;;  %1529 = vrcp.f32 %v1988_v59  ;;  %v2052_v61 = vpop.xlane.xlu1 %267 }
 0x153   :  { %v680_v3 = vrot.slane %v679_v49, 2  ;;  %v619_v22 = vmax.f32 %v1979_v56, %v618_v2  ;;  %v522_v20 = vadd.f32 %v521_v29, %v520_v46  ;;  %v784_v23 = vadd.f32 %v1947_v19, %v783_v62 }
 0x154   :  { %v2007_v17 = vpop.eup %1525  ;;  %v612_v27 = vrot.slane %v2000_v4, 4  ;;  %v792_v28 = vor.u32 1.1754944e-38, %v791_v0  ;;  %vm472_vm2 = vweird.f32 %v1943_v18  ;;  %v313_v26 = vmax.f32 %v311_v63, %v312_v16 }
 0x155   :  { %v356_v25 = vrot.slane %v2007_v17, 4  ;;  %v620_v30 = vrot.slane %v619_v22, 2  ;;  %v2017_v31 = vpop.eup %1527  ;;  %v550_v32 = vadd.f32 %v549_v5, %v548_v57  ;;  %v734_v34 = vmul.f32 %v1875_v53, %v733_v21 }
 0x156   :  { %v470_v24 = vmul.f32 %v1962_v42, %v469_v58  ;;  %v479_v39 = vor.u32 1.1754944e-38, %v478_v14  ;;  %v681_v41 = vadd.f32 %v680_v3, %v679_v49  ;;  %v326_v40 = vsub.f32 %v1938_v6, %v313_v26  ;;  %v2072_v3 = vpop.xlane.xlu2 %246 }
 0x157   :  { %v357_v37 = vadd.f32 %v2007_v17, %v356_v25  ;;  %v621_v15 = vmax.f32 %v619_v22, %v620_v30  ;;  %v523_v43 = vrot.slane %v522_v20, 2  ;;  %v788_v53 = vsel %vm2026_vm3, %v1947_v19, %v784_v23 }
 0x158   :  { %vm2034_vm4 = vcmp.eq.f32.partialorder %v476_v1, 8.507059e+37  ;;  %v804_v55 = vand.u32 2147483647, %v1988_v59  ;;  %v613_v44 = vmax.f32 %v2000_v4, %v612_v27  ;;  %v2040_v46 = vpop.eup %1529  ;;  %vm473_vm5 = vweird.f32 %v1962_v42 }
 0x159   :  { %v806_v6 = vand.u32 2147483648, %v1988_v59  ;;  %v408_v47 = vmul.f32 %v2017_v31, %v1968_v50  ;;  %v358_v48 = vrot.slane %v357_v37, 2  ;;  %v551_v51 = vrot.slane %v550_v32, 2  ;;  %vm2062_vm6 = vmor %vm472_vm2, %vm473_vm5 }
 0x15a   :  { %v840_v19 = vmul.f32 %v734_v34, %v1733_v10  ;;  %v471_v52 = vadd.f32 %v1962_v42, %v470_v24  ;;  %v340_v9 = vmul.f32 1.442695, %v326_v40  ;;  %v793_v57 = vsel %vm2002_vm1, %v792_v28, %v788_v53 }
 0x15b   :  { %v682_v29 = vrot.slane %v681_v41, 1  ;;  %v359_v35 = vadd.f32 %v358_v48, %v357_v37  ;;  %v622_v49 = vrot.slane %v621_v15, 1  ;;  %v2054_v62 = vadd.f32 %v523_v43, %v522_v20 }
 0x15c   :  { %v796_v63 = vmul.f32 %v2040_v46, %v1988_v59  ;;  %1531 = vpow2.f32 %v340_v9  ;;  %v614_v10 = vrot.slane %v613_v44, 2  ;;  %v409_v1 = vsub.f32 1.0, %v408_v47 }
 0x15d   :  { %v360_v2 = vrot.slane %v359_v35, 1  ;;  %v623_v5 = vmax.f32 %v621_v15, %v622_v49  ;;  %v290_v12 = vrot.slane %v2048_v54, 4  ;;  %v794_v58 = vmul.f32 %v1879_v60, %v793_v57 }
 0x15e   :  { %v475_v14 = vsel %vm2062_vm6, %v1962_v42, %v471_v52  ;;  %v615_v16 = vmax.f32 %v613_v44, %v614_v10  ;;  %v636_v21 = vrot.slane %v2052_v61, 4  ;;  %v2074_v18 = vadd.f32 %v551_v51, %v550_v32 }
 0x15f   :  { %v2076_v22 = vor.u32 1.1754944e-38, %v806_v6  ;;  %v2078_v20 = vadd.f32 %v682_v29, %v681_v41  ;;  %v2080_v23 = vadd.f32 %v360_v2, %v359_v35  ;;  %v797_v25 = vsub.f32 1.0, %v796_v63 }
 0x160   :  { %v651_v60 = vsub.f32 %v1979_v56, %v623_v5  ;;  %v616_v27 = vrot.slane %v615_v16, 1  ;;  %v291_v28 = vmax.f32 %v2048_v54, %v290_v12  ;;  %v848_v42 = vsel %vm74_vm0, %v840_v19, 0.0 }
 0x161   :  { %v480_v26 = vsel %vm2034_vm4, %v479_v39, %v475_v14  ;;  %v410_v30 = vmul.f32 %v2017_v31, %v409_v1  ;;  %v314_v32 = vrot.slane %v2072_v3, 4  ;;  %vm801_vm7 = vweird.f32 %v2040_v46  ;;  %v2129_v1 = vpop.xlane.xlu0 %270 }
 0x162   :  { %v2089_v34 = vpop.eup %1531  ;;  %1533 = vrcp.f32 %v2080_v23  ;;  %v662_v24 = vmul.f32 1.442695, %v651_v60  ;;  %v617_v56 = vmax.f32 %v615_v16, %v616_v27  ;;  %v637_v37 = vmax.f32 %v2052_v61, %v636_v21 }
 0x163   :  { %v525_v38 = vrot.slane %v2054_v62, 1  ;;  %1535 = vrcp.f32 %v2078_v20  ;;  %v380_v39 = vrot.slane %v2089_v34, 4  ;;  %v292_v41 = vrot.slane %v291_v28, 2 }
 0x164   :  { %v849_v40 = vrot.slane %v848_v42, 4  ;;  %v798_v15 = vmul.f32 %v2040_v46, %v797_v25  ;;  %vm800_vm8 = vweird.f32 %v1988_v59  ;;  %1537 = vpow2.f32 %v662_v24 }
 0x165   :  { %v650_v43 = vsub.f32 %v2000_v4, %v617_v56  ;;  %v481_v53 = vmul.f32 %v1891_v7, %v480_v26  ;;  %vm413_vm9 = vweird.f32 %v2017_v31  ;;  %v381_v8 = vadd.f32 %v2089_v34, %v380_v39  ;;  %vm2151_vm13 = vmor %vm800_vm8, %vm801_vm7 }
 0x166   :  { %v293_v44 = vmax.f32 %v291_v28, %v292_v41  ;;  %v411_v6 = vadd.f32 %v2017_v31, %v410_v30  ;;  %v638_v48 = vrot.slane %v637_v37, 2  ;;  %v315_v51 = vmax.f32 %v2072_v3, %v314_v32 }
 0x167   :  { %v660_v47 = vmul.f32 1.442695, %v650_v43  ;;  %v553_v19 = vrot.slane %v2074_v18, 1  ;;  %v844_v52 = vmul.f32 %v794_v58, %v1738_v11  ;;  %v382_v9 = vrot.slane %v381_v8, 2 }
 0x168   :  { %v294_v57 = vrot.slane %v293_v44, 1  ;;  %v2107_v4 = vpop.eup %1533  ;;  %v2109_v7 = vadd.f32 %v849_v40, %v848_v42  ;;  %vm2113_vm10 = vcmp.eq.f32.partialorder %v804_v55, 8.507059e+37  ;;  %vm412_vm11 = vweird.f32 %v1968_v50 }
 0x169   :  { %v416_v35 = vand.u32 2147483647, %v1968_v50  ;;  %1539 = vpow2.f32 %v660_v47  ;;  %v2119_v49 = vpop.eup %1535  ;;  %v799_v11 = vadd.f32 %v2040_v46, %v798_v15  ;;  %vm2124_vm12 = vmor %vm412_vm11, %vm413_vm9  ;;  %v418_v55 = vand.u32 2147483648, %v1968_v50 }
 0x16a   :  { %v383_v10 = vadd.f32 %v382_v9, %v381_v8  ;;  %v295_v0 = vmax.f32 %v293_v44, %v294_v57  ;;  %v2131_v2 = vpop.eup %1537  ;;  %v517_v5 = vmul.f32 %v481_v53, %v1754_v13  ;;  %v415_v12 = vsel %vm2124_vm12, %v2017_v31, %v411_v6 }
 0x16b   :  { %v639_v58 = vmax.f32 %v637_v37, %v638_v48  ;;  %v316_v14 = vrot.slane %v315_v51, 2  ;;  %v423_v16 = vmul.f32 %v2107_v4, %v2080_v23  ;;  %v690_v50 = vrot.slane %v2131_v2, 4 }
 0x16c   :  { %v384_v21 = vrot.slane %v383_v10, 1  ;;  %v323_v25 = vsub.f32 %v2048_v54, %v295_v0  ;;  %v736_v60 = vmul.f32 %v2119_v49, %v2078_v20  ;;  %v642_v13 = vrot.slane %v2129_v1, 4 }
 0x16d   :  { %v640_v27 = vrot.slane %v639_v58, 1  ;;  %v317_v28 = vmax.f32 %v315_v51, %v316_v14  ;;  %v2145_v42 = vsel %vm74_vm0, %v844_v52, 0.0  ;;  %v419_v26 = vor.u32 1.1754944e-38, %v418_v55 }
 0x16e   :  { %v691_v54 = vadd.f32 %v2131_v2, %v690_v50  ;;  %v334_v30 = vmul.f32 1.442695, %v323_v25  ;;  %v555_v24 = vsel %vm74_vm0, %v517_v5, 0.0  ;;  %v803_v56 = vsel %vm2151_vm13, %v2040_v46, %v799_v11  ;;  %v1563_v5 = vld [vmem:[%s2591_s0 + $0x8] sm:$0xff] }
 0x16f   :  { %v2156_v32 = vpop.eup %1539  ;;  %vm417_vm14 = vcmp.eq.f32.partialorder %v416_v35, 8.507059e+37  ;;  %v2162_v37 = vadd.f32 %v384_v21, %v383_v10  ;;  %v424_v39 = vsub.f32 1.0, %v423_v16  ;;  %v641_v41 = vmax.f32 %v639_v58, %v640_v27 }
 0x170   :  { %v420_v59 = vsel %vm417_vm14, %v419_v26, %v415_v12  ;;  %v318_v40 = vrot.slane %v317_v28, 1  ;;  %v737_v15 = vsub.f32 1.0, %v736_v60  ;;  %v692_v43 = vrot.slane %v691_v54, 2 }
 0x171   :  { %v684_v53 = vrot.slane %v2156_v32, 4  ;;  %v643_v8 = vmax.f32 %v2129_v1, %v642_v13  ;;  %v877_v44 = vrot.slane %v2145_v42, 4  ;;  %v556_v6 = vrot.slane %v555_v24, 4  ;;  %v1564_v13 = vld [vmem:[%s2592_s1 + $0x28] sm:$0xff] }
 0x172   :  { %v808_v46 = vsel %vm2113_vm10, %v2076_v22, %v803_v56  ;;  %1541 = vpow2.f32 %v334_v30  ;;  %v421_v47 = vmul.f32 %v1908_v36, %v420_v59  ;;  %v693_v48 = vadd.f32 %v692_v43, %v691_v54 }
 0x173   :  { %1543 = vrcp.f32 %v2162_v37  ;;  %v685_v51 = vadd.f32 %v2156_v32, %v684_v53  ;;  %v851_v52 = vrot.slane %v2109_v7, 2  ;;  %v425_v9 = vmul.f32 %v2107_v4, %v424_v39 }
 0x174   :  { %v654_v57 = vsub.f32 %v2052_v61, %v641_v41  ;;  %v319_v35 = vmax.f32 %v317_v28, %v318_v40  ;;  %v738_v11 = vmul.f32 %v2119_v49, %v737_v15  ;;  %v694_v63 = vrot.slane %v693_v48, 1 }
 0x175   :  { %v686_v29 = vrot.slane %v685_v51, 2  ;;  %v644_v22 = vrot.slane %v643_v8, 2  ;;  %v2177_v55 = vadd.f32 %v556_v6, %v555_v24  ;;  %v809_v36 = vmul.f32 %v1911_v45, %v808_v46 }
 0x176   :  { %v668_v10 = vmul.f32 1.442695, %v654_v57  ;;  %v327_v0 = vsub.f32 %v2072_v3, %v319_v35  ;;  %v513_v12 = vmul.f32 %v1563_v5, %v421_v47  ;;  %vm741_vm15 = vweird.f32 %v2119_v49 }
 0x177   :  { %vm428_vm1 = vweird.f32 %v2107_v4  ;;  %v433_v61 = vand.u32 2147483648, %v2080_v23  ;;  %v426_v14 = vadd.f32 %v2107_v4, %v425_v9  ;;  %v2190_v16 = vadd.f32 %v694_v63, %v693_v48 }
 0x178   :  { %v2187_v58 = vpop.eup %1541  ;;  %v687_v45 = vadd.f32 %v686_v29, %v685_v51  ;;  %1545 = vpow2.f32 %v668_v10  ;;  %v739_v21 = vadd.f32 %v2119_v49, %v738_v11  ;;  %v342_v25 = vmul.f32 1.442695, %v327_v0 }
 0x179   :  { %v2192_v3 = vpop.eup %1543  ;;  %v362_v50 = vrot.slane %v2187_v58, 4  ;;  %v645_v60 = vmax.f32 %v643_v8, %v644_v22  ;;  %v746_v27 = vand.u32 2147483648, %v2078_v20  ;;  %vm427_vm2 = vweird.f32 %v2080_v23 }
 0x17a   :  { %v431_v28 = vand.u32 2147483647, %v2080_v23  ;;  %1547 = vrcp.f32 %v2190_v16  ;;  %v845_v31 = vmul.f32 %v1564_v13, %v809_v36  ;;  %v527_v26 = vsel %vm74_vm0, %v513_v12, 0.0  ;;  %vm2208_vm4 = vmor %vm427_vm2, %vm428_vm1 }
 0x17b   :  { %vm740_vm3 = vweird.f32 %v2078_v20  ;;  %v744_v54 = vand.u32 2147483647, %v2078_v20  ;;  %v430_v24 = vsel %vm2208_vm4, %v2107_v4, %v426_v14  ;;  %v483_v56 = vmul.f32 %v2192_v3, %v2162_v37 }
 0x17c   :  { %vm2214_vm5 = vmor %vm740_vm3, %vm741_vm15  ;;  %v688_v20 = vrot.slane %v687_v45, 1  ;;  %v363_v59 = vadd.f32 %v2187_v58, %v362_v50  ;;  %v434_v41 = vor.u32 1.1754944e-38, %v433_v61  ;;  %1549 = vpow2.f32 %v342_v25 }
 0x17d   :  { %v743_v39 = vsel %vm2214_vm5, %v2119_v49, %v739_v21  ;;  %v646_v40 = vrot.slane %v645_v60, 1  ;;  %v747_v43 = vor.u32 1.1754944e-38, %v746_v27  ;;  %vm432_vm6 = vcmp.eq.f32.partialorder %v431_v28, 8.507059e+37 }
 0x17e   :  { %v2227_v15 = vpop.eup %1545  ;;  %v2229_v53 = vadd.f32 %v688_v20, %v687_v45  ;;  %v364_v4 = vrot.slane %v363_v59, 2  ;;  %v528_v8 = vrot.slane %v527_v26, 4  ;;  %vm745_vm7 = vcmp.eq.f32.partialorder %v744_v54, 8.507059e+37 }
 0x17f   :  { %v435_v6 = vsel %vm432_vm6, %v434_v41, %v430_v24  ;;  %v708_v46 = vrot.slane %v2227_v15, 4  ;;  %v2237_v49 = vadd.f32 %v525_v38, %v2054_v62  ;;  %v748_v48 = vsel %vm745_vm7, %v747_v43, %v743_v39 }
 0x180   :  { %v2232_v47 = vpop.eup %1547  ;;  %v484_v51 = vsub.f32 1.0, %v483_v56  ;;  %1551 = vrcp.f32 %v2229_v53  ;;  %v2243_v9 = vadd.f32 %v553_v19, %v2074_v18  ;;  %v2246_v57 = vsel %vm74_vm0, %v845_v31, 0.0 }
 0x181   :  { %v766_v35 = vmul.f32 %v2232_v47, %v2190_v16  ;;  %v647_v11 = vmax.f32 %v645_v60, %v646_v40  ;;  %v2253_v62 = vadd.f32 %v877_v44, %v2145_v42  ;;  %v436_v38 = vmul.f32 %v2007_v17, %v435_v6  ;;  %v1566_v60 = vld [vmem:[%s2592_s1 + $0x8] sm:$0xff] }
 0x182   :  { %v365_v63 = vadd.f32 %v364_v4, %v363_v59  ;;  %v709_v29 = vadd.f32 %v2227_v15, %v708_v46  ;;  %v2257_v22 = vpop.eup %1549  ;;  %v2262_v18 = vadd.f32 %v851_v52, %v2109_v7  ;;  %v558_v19 = vrot.slane %v2177_v55, 2  ;;  %v1565_v52 = vld [vmem:[%s2591_s0 + $0x10] sm:$0xff] }
 0x183   :  { %v529_v36 = vadd.f32 %v528_v8, %v527_v26  ;;  %v749_v10 = vmul.f32 %v1953_v33, %v748_v48  ;;  %v884_v42 = vrot.slane %v2246_v57, 4  ;;  %v485_v44 = vmul.f32 %v2192_v3, %v484_v51 }
 0x184   :  { %v366_v17 = vrot.slane %v365_v63, 1  ;;  %v710_v0 = vrot.slane %v709_v29, 2  ;;  %v491_v5 = vand.u32 2147483647, %v2162_v37  ;;  %v767_v12 = vsub.f32 1.0, %v766_v35 }
 0x185   :  { %v386_v61 = vrot.slane %v2257_v22, 4  ;;  %v655_v14 = vsub.f32 %v2129_v1, %v647_v11  ;;  %v514_v45 = vmul.f32 %v1565_v52, %v436_v38  ;;  %v493_v33 = vand.u32 2147483648, %v2162_v37 }
 0x186   :  { %v1552_v7 = vpop.eup %1551  ;;  %v2275_v21 = vadd.f32 %v366_v17, %v365_v63  ;;  %v711_v50 = vadd.f32 %v710_v0, %v709_v29  ;;  %v530_v25 = vrot.slane %v529_v36, 2  ;;  %v841_v27 = vmul.f32 %v1566_v60, %v749_v10 }
 0x187   :  { %v751_v28 = vmul.f32 %v1552_v7, %v2229_v53  ;;  %v387_v1 = vadd.f32 %v2257_v22, %v386_v61  ;;  %v486_v13 = vadd.f32 %v2192_v3, %v485_v44  ;;  %vm487_vm8 = vweird.f32 %v2162_v37 }
 0x188   :  { %vm488_vm9 = vweird.f32 %v2192_v3  ;;  %1553 = vrcp.f32 %v2275_v21  ;;  %v768_v31 = vmul.f32 %v2232_v47, %v767_v12  ;;  %v712_v54 = vrot.slane %v711_v50, 1 }
 0x189   :  { %v752_v26 = vsub.f32 1.0, %v751_v28  ;;  %v670_v30 = vmul.f32 1.442695, %v655_v14  ;;  %v534_v23 = vsel %vm74_vm0, %v514_v45, 0.0  ;;  %vm2288_vm10 = vcmp.eq.f32.partialorder %v491_v5, 8.507059e+37  ;;  %vm2292_vm11 = vmor %vm487_vm8, %vm488_vm9 }
 0x18a   :  { %v494_v56 = vor.u32 1.1754944e-38, %v493_v33  ;;  %v388_v20 = vrot.slane %v387_v1, 2  ;;  %vm770_vm12 = vweird.f32 %v2190_v16  ;;  %vm756_vm13 = vweird.f32 %v1552_v7 }
 0x18b   :  { %v753_v37 = vmul.f32 %v1552_v7, %v752_v26  ;;  %v761_v39 = vand.u32 2147483648, %v2229_v53  ;;  %v490_v41 = vsel %vm2292_vm11, %v2192_v3, %v486_v13  ;;  %vm755_vm14 = vweird.f32 %v2229_v53 }
 0x18c   :  { %v759_v40 = vand.u32 2147483647, %v2229_v53  ;;  %v2303_v43 = vadd.f32 %v712_v54, %v711_v50  ;;  %v769_v4 = vadd.f32 %v2232_v47, %v768_v31  ;;  %vm771_vm15 = vweird.f32 %v2232_v47  ;;  %vm757_vm1 = vmor %vm755_vm14, %vm756_vm13 }
 0x18d   :  { %v754_v8 = vadd.f32 %v1552_v7, %v753_v37  ;;  %1555 = vpow2.f32 %v670_v30  ;;  %v774_v46 = vand.u32 2147483647, %v2190_v16  ;;  %v776_v48 = vand.u32 2147483648, %v2190_v16  ;;  %vm2323_vm2 = vmor %vm770_vm12, %vm771_vm15 }
 0x18e   :  { %v1554_v6 = vpop.eup %1553  ;;  %1557 = vrcp.f32 %v2303_v43  ;;  %v389_v3 = vadd.f32 %v388_v20, %v387_v1  ;;  %v495_v53 = vsel %vm2288_vm10, %v494_v56, %v490_v41  ;;  %v762_v35 = vor.u32 1.1754944e-38, %v761_v39  ;;  %v1569_v41 = vld [vmem:[%s2592_s1 + $0x18] sm:$0xff] }
 0x18f   :  { %v758_v51 = vsel %vm757_vm1, %v1552_v7, %v754_v8  ;;  %v438_v11 = vmul.f32 %v1554_v6, %v2275_v21  ;;  %v2314_v38 = vadd.f32 %v558_v19, %v2177_v55  ;;  %v2316_v63 = vadd.f32 %v530_v25, %v529_v36 }
 0x190   :  { %v855_v29 = vsel %vm74_vm0, %v841_v27, 0.0  ;;  %vm760_vm3 = vcmp.eq.f32.partialorder %v759_v40, 8.507059e+37  ;;  %v535_v44 = vrot.slane %v534_v23, 4  ;;  %v773_v17 = vsel %vm2323_vm2, %v2232_v47, %v769_v4  ;;  %v1567_v27 = vld [vmem:[%s2591_s0 + $0x30] sm:$0xff]  ;;  %v1570_v4 = vld [vmem:[%s2591_s0 + $0x18] sm:$0xff] }
 0x191   :  { %v763_v55 = vsel %vm760_vm3, %v762_v35, %v758_v51  ;;  %v439_v19 = vsub.f32 1.0, %v438_v11  ;;  %v496_v36 = vmul.f32 %v2089_v34, %v495_v53  ;;  %v777_v0 = vor.u32 1.1754944e-38, %v776_v48 }
 0x192   :  { %v448_v5 = vand.u32 2147483648, %v2275_v21  ;;  %v390_v12 = vrot.slane %v389_v3, 1  ;;  %vm775_vm4 = vcmp.eq.f32.partialorder %v774_v46, 8.507059e+37  ;;  %vm443_vm5 = vweird.f32 %v1554_v6 }
 0x193   :  { %v2332_v61 = vpop.eup %1555  ;;  %v440_v16 = vmul.f32 %v1554_v6, %v439_v19  ;;  %v446_v14 = vand.u32 2147483647, %v2275_v21  ;;  %v778_v52 = vsel %vm775_vm4, %v777_v0, %v773_v17  ;;  %v764_v45 = vmul.f32 %v2156_v32, %v763_v55 }
 0x194   :  { %v1558_v7 = vpop.eup %1557  ;;  %v2336_v47 = vadd.f32 %v390_v12, %v389_v3  ;;  %v714_v33 = vrot.slane %v2332_v61, 4  ;;  %v856_v34 = vrot.slane %v855_v29, 4  ;;  %vm442_vm6 = vweird.f32 %v2275_v21  ;;  %v1568_v21 = vld [vmem:[%s2592_s1 + $0x10] sm:$0xff] }
 0x195   :  { %v441_v50 = vadd.f32 %v1554_v6, %v440_v16  ;;  %v811_v25 = vmul.f32 %v1558_v7, %v2303_v43  ;;  %v536_v60 = vadd.f32 %v535_v44, %v534_v23  ;;  %v518_v28 = vmul.f32 %v1567_v27, %v496_v36  ;;  %vm444_vm7 = vmor %vm442_vm6, %vm443_vm5 }
 0x196   :  { %v449_v1 = vor.u32 1.1754944e-38, %v448_v5  ;;  %1559 = vrcp.f32 %v2336_v47  ;;  %v779_v32 = vmul.f32 %v2131_v2, %v778_v52  ;;  %vm447_vm8 = vcmp.eq.f32.partialorder %v446_v14, 8.507059e+37 }
 0x197   :  { %v445_v13 = vsel %vm444_vm7, %v1554_v6, %v441_v50  ;;  %v812_v31 = vsub.f32 1.0, %v811_v25  ;;  %v842_v26 = vmul.f32 %v1568_v21, %v764_v45  ;;  %v821_v30 = vand.u32 2147483648, %v2303_v43 }
 0x198   :  { %v450_v54 = vsel %vm447_vm8, %v449_v1, %v445_v13  ;;  %v715_v23 = vadd.f32 %v2332_v61, %v714_v33  ;;  %vm816_vm9 = vweird.f32 %v1558_v7  ;;  %v819_v20 = vand.u32 2147483647, %v2303_v43 }
 0x199   :  { %v451_v24 = vmul.f32 %v2187_v58, %v450_v54  ;;  %v813_v56 = vmul.f32 %v1558_v7, %v812_v31  ;;  %v532_v2 = vrot.slane %v2316_v63, 1  ;;  %v857_v59 = vadd.f32 %v856_v34, %v855_v29  ;;  %v1571_v34 = vld [vmem:[%s2592_s1 + $0x30] sm:$0xff] }
 0x19a   :  { %v537_v37 = vrot.slane %v536_v60, 2  ;;  %v716_v39 = vrot.slane %v715_v23, 2  ;;  %v843_v40 = vmul.f32 %v1569_v41, %v779_v32  ;;  %vm815_vm10 = vweird.f32 %v2303_v43 }
 0x19b   :  { %v515_v8 = vmul.f32 %v1570_v4, %v451_v24  ;;  %v814_v58 = vadd.f32 %v1558_v7, %v813_v56  ;;  %v562_v46 = vsel %vm74_vm0, %v518_v28, 0.0  ;;  %v862_v48 = vsel %vm74_vm0, %v842_v26, 0.0  ;;  %vm817_vm11 = vmor %vm815_vm10, %vm816_vm9 }
 0x19c   :  { %v1560_v6 = vpop.eup %1559  ;;  %v822_v3 = vor.u32 1.1754944e-38, %v821_v30  ;;  %v717_v53 = vadd.f32 %v716_v39, %v715_v23  ;;  %vm820_vm12 = vcmp.eq.f32.partialorder %v819_v20, 8.507059e+37  ;;  %v538_v29 = vadd.f32 %v537_v37, %v536_v60  ;;  %v1572_v39 = vld [vmem:[%s2591_s0 + $0x38] sm:$0xff] }
 0x19d   :  { %v541_v51 = vsel %vm74_vm0, %v515_v8, 0.0  ;;  %v818_v35 = vsel %vm817_vm11, %v1558_v7, %v814_v58  ;;  %v498_v11 = vmul.f32 %v1560_v6, %v2336_v47  ;;  %vm584_vm13 = vcmask 1041409  }
 0x19e   :  { %v542_v10 = vrot.slane %v541_v51, 4  ;;  %v823_v44 = vsel %vm820_vm12, %v822_v3, %v818_v35  ;;  %v718_v17 = vrot.slane %v717_v53, 1  ;;  %v869_v43 = vsel %vm74_vm0, %v843_v40, 0.0 }
 0x19f   :  { %v863_v55 = vrot.slane %v862_v48, 4  ;;  %v824_v19 = vmul.f32 %v2227_v15, %v823_v44  ;;  %v499_v36 = vsub.f32 1.0, %v498_v11  ;;  %v563_v0 = vrot.slane %v562_v46, 4 }
 0x1a0   :  { %v543_v5 = vadd.f32 %v542_v10, %v541_v51  ;;  %v508_v12 = vand.u32 2147483648, %v2336_v47  ;;  %v2369_v16 = vadd.f32 %v718_v17, %v717_v53  ;;  %v858_v14 = vrot.slane %v857_v59, 2 }
 0x1a1   :  { %v500_v7 = vmul.f32 %v1560_v6, %v499_v36  ;;  %vm503_vm14 = vweird.f32 %v1560_v6  ;;  %v506_v52 = vand.u32 2147483647, %v2336_v47  ;;  %v870_v45 = vrot.slane %v869_v43, 4 }
 0x1a2   :  { %v544_v33 = vrot.slane %v543_v5, 2  ;;  %v846_v50 = vmul.f32 %v1571_v34, %v824_v19  ;;  %1561 = vrcp.f32 %v2369_v16  ;;  %v2379_v15 = vadd.f32 %v884_v42, %v2246_v57 }
 0x1a3   :  { %v864_v25 = vadd.f32 %v863_v55, %v862_v48  ;;  %v501_v60 = vadd.f32 %v1560_v6, %v500_v7  ;;  %vm502_vm15 = vweird.f32 %v2336_v47  ;;  %v539_v27 = vrot.slane %v538_v29, 1 }
 0x1a4   :  { %v564_v28 = vadd.f32 %v563_v0, %v562_v46  ;;  %v545_v1 = vadd.f32 %v544_v33, %v543_v5  ;;  %vm504_vm1 = vmor %vm502_vm15, %vm503_vm14  ;;  %v509_v32 = vor.u32 1.1754944e-38, %v508_v12  ;;  %v533_v13 = vadd.f32 %v532_v2, %v2316_v63 }
 0x1a5   :  { %v859_v31 = vadd.f32 %v858_v14, %v857_v59  ;;  %v505_v21 = vsel %vm504_vm1, %v1560_v6, %v501_v60  ;;  %vm507_vm2 = vcmp.eq.f32.partialorder %v506_v52, 8.507059e+37  ;;  %v871_v26 = vadd.f32 %v870_v45, %v869_v43 }
 0x1a6   :  { %v546_v54 = vrot.slane %v545_v1, 1  ;;  %v890_v30 = vsel %vm74_vm0, %v846_v50, 0.0  ;;  %v510_v57 = vsel %vm507_vm2, %v509_v32, %v505_v21  ;;  %v853_v42 = vrot.slane %v2262_v18, 1 }
 0x1a7   :  { %v879_v23 = vrot.slane %v2253_v62, 2  ;;  %v865_v47 = vrot.slane %v864_v25, 2  ;;  %v511_v24 = vmul.f32 %v2257_v22, %v510_v57  ;;  %v560_v20 = vrot.slane %v2314_v38, 1 }
 0x1a8   :  { %v1562_v56 = vpop.eup %1561  ;;  %v886_v63 = vrot.slane %v2379_v15, 2  ;;  %v540_v2 = vadd.f32 %v539_v27, %v538_v29  ;;  %v565_v59 = vrot.slane %v564_v28, 2  ;;  %vm586_vm3 = vcmask 1042434  }
 0x1a9   :  { %v891_v37 = vrot.slane %v890_v30, 4  ;;  %v519_v41 = vmul.f32 %v1572_v39, %v511_v24  ;;  %v826_v40 = vmul.f32 %v1562_v56, %v2369_v16  ;;  %v585_v4 = vsel %vm584_vm13, %v533_v13, %v2237_v49 }
 0x1aa   :  { %v860_v22 = vrot.slane %v859_v31, 1  ;;  %v872_v8 = vrot.slane %v871_v26, 2  ;;  %v547_v58 = vadd.f32 %v546_v54, %v545_v1  ;;  %vm588_vm4 = vcmask 1043459   ;;  %v1573_v1 = vld [vmem:[%s2592_s1 + $0x38] sm:$0xff]  ;;  %s2424_s1 = smov 0  }
 0x1ab   :  { %v866_v6 = vadd.f32 %v865_v47, %v864_v25  ;;  %v569_v46 = vsel %vm74_vm0, %v519_v41, 0.0  ;;  %v827_v48 = vsub.f32 1.0, %v826_v40  ;;  %v587_v3 = vsel %vm586_vm3, %v540_v2, %v585_v4 }
 0x1ac   :  { %v566_v53 = vadd.f32 %v565_v59, %v564_v28  ;;  %v570_v51 = vrot.slane %v569_v46, 4  ;;  %v836_v35 = vand.u32 2147483648, %v2369_v16  ;;  %v892_v11 = vadd.f32 %v891_v37, %v890_v30 }
 0x1ad   :  { %v828_v29 = vmul.f32 %v1562_v56, %v827_v48  ;;  %vm831_vm5 = vweird.f32 %v1562_v56  ;;  %v834_v10 = vand.u32 2147483647, %v2369_v16  ;;  %v873_v49 = vadd.f32 %v872_v8, %v871_v26 }
 0x1ae   :  { %vm590_vm6 = vcmask 1044484   ;;  %v589_v44 = vsel %vm588_vm4, %v547_v58, %v587_v3  ;;  %v571_v17 = vadd.f32 %v570_v51, %v569_v46  ;;  %v561_v43 = vadd.f32 %v560_v20, %v2314_v38 }
 0x1af   :  { %v867_v55 = vrot.slane %v866_v6, 1  ;;  %v829_v19 = vadd.f32 %v1562_v56, %v828_v29  ;;  %vm830_vm7 = vweird.f32 %v2369_v16  ;;  %v567_v36 = vrot.slane %v566_v53, 1 }
 0x1b0   :  { %vm592_vm8 = vcmask 1045509   ;;  %v572_v0 = vrot.slane %v571_v17, 2  ;;  %vm832_vm9 = vmor %vm830_vm7, %vm831_vm5  ;;  %v837_v5 = vor.u32 1.1754944e-38, %v836_v35  ;;  %v591_v12 = vsel %vm590_vm6, %v2243_v9, %v589_v44 }
 0x1b1   :  { %v893_v14 = vrot.slane %v892_v11, 2  ;;  %v833_v7 = vsel %vm832_vm9, %v1562_v56, %v829_v19  ;;  %vm835_vm10 = vcmp.eq.f32.partialorder %v834_v10, 8.507059e+37  ;;  %v861_v52 = vadd.f32 %v860_v22, %v859_v31 }
 0x1b2   :  { %v874_v45 = vrot.slane %v873_v49, 1  ;;  %v573_v33 = vadd.f32 %v572_v0, %v571_v17  ;;  %v838_v34 = vsel %vm835_vm10, %v837_v5, %v833_v7  ;;  %v880_v38 = vadd.f32 %v879_v23, %v2253_v62 }
 0x1b3   :  { %v868_v50 = vadd.f32 %v867_v55, %v866_v6  ;;  %v839_v16 = vmul.f32 %v2332_v61, %v838_v34  ;;  %v854_v25 = vadd.f32 %v853_v42, %v2262_v18  ;;  %vm594_vm11 = vcmask 1046534  }
 0x1b4   :  { %v574_v60 = vrot.slane %v573_v33, 1  ;;  %v593_v27 = vsel %vm592_vm8, %v561_v43, %v591_v12  ;;  %v568_v28 = vadd.f32 %v567_v36, %v566_v53  ;;  %v894_v9 = vadd.f32 %v893_v14, %v892_v11 }
 0x1b5   :  { %vm596_vm12 = vcmask 1047559   ;;  %v847_v32 = vmul.f32 %v1573_v1, %v839_v16  ;;  %v887_v13 = vadd.f32 %v886_v63, %v2379_v15  ;;  %v912_v62 = vsel %vm584_vm13, %v861_v52, %v854_v25 }
 0x1b6   :  { %v875_v31 = vadd.f32 %v874_v45, %v873_v49  ;;  %v575_v61 = vadd.f32 %v574_v60, %v573_v33  ;;  %v881_v21 = vrot.slane %v880_v38, 1  ;;  %v913_v18 = vsel %vm586_vm3, %v868_v50, %v912_v62 }
 0x1b7   :  { %v595_v26 = vsel %vm594_vm11, %v568_v28, %v593_v27  ;;  %v897_v54 = vsel %vm74_vm0, %v847_v32, 0.0  ;;  %v895_v42 = vrot.slane %v894_v9, 1  ;;  %v888_v23 = vrot.slane %v887_v13, 1 }
 0x1b8   :  { %v597_v30 = vsel %vm596_vm12, %v575_v61, %v595_v26  ;;  %v898_v57 = vrot.slane %v897_v54, 4  ;;  %v914_v15 = vsel %vm588_vm4, %v875_v31, %v913_v18  ;;  %v882_v24 = vadd.f32 %v881_v21, %v880_v38 }
 0x1b9   :  { %599 = vst.msk [vmem:[#allocation2] sm:$0xff] %vm74_vm0, %v597_v30  ;;  %v896_v20 = vadd.f32 %v895_v42, %v894_v9  ;;  %v889_v2 = vadd.f32 %v888_v23, %v887_v13 }
 0x1ba   :  { %v899_v47 = vadd.f32 %v898_v57, %v897_v54  ;;  %v915_v63 = vsel %vm590_vm6, %v882_v24, %v914_v15 }
 0x1bb   :  { %v916_v37 = vsel %vm592_vm8, %v889_v2, %v915_v63 }
 0x1bc   :  { %v900_v56 = vrot.slane %v899_v47, 2  ;;  %v917_v41 = vsel %vm594_vm11, %v896_v20, %v916_v37 }
 0x1be   :  { %v901_v59 = vadd.f32 %v900_v56, %v899_v47 }
 0x1c0   :  { %v902_v39 = vrot.slane %v901_v59, 1 }
 0x1c2   :  { %v903_v40 = vadd.f32 %v902_v39, %v901_v59 }
 0x1c4   :  { %v918_v4 = vsel %vm596_vm12, %v903_v40, %v917_v41 }
 0x1c5   :  { %920 = vst.msk [vmem:[#allocation3] sm:$0xff] %vm74_vm0, %v918_v4 }
 0x1c6 LB: > { %v1640_v22 = vmov 0   ;;  %s1413_s15 = sshll.u32 %s1637_s1, 2  ;;  %v1641_v48 = vmov 0.0   ;;  %vm1020_vm15 = vcmask 519168   ;;  %vm946_vm2 = vcmask 64512   ;;  %s1033_s3 = ssub.f32 0.0, %s1700_s14  ;;  %s1637_s1 = sphi %s2424_s1, %s926_s1  }
 0x1c7   : > { %1574 = vset.pattern.permute.xlu0 %v1640_v22  ;;  %1575 = vset.pattern.permute.xlu1 %v1640_v22  ;;  %s930_s16 = scalar_lea.vmem [#allocation3], %s1413_s15  ;;  %s928_s17 = scalar_lea.vmem [#allocation2], %s1413_s15  ;;  %v1043_v38 = vlaneseq  ;;  %v998_v24 = vstv %s1695_s11  ;;  %vm1074_vm10 = vcmask 27648  }
 0x1c8   : > { %v2434_v58 = vld [vmem:[%s928_s17] sm:$0xf]  ;;  %v1034_v50 = vstv %s1033_s3  ;;  %s1642_s4 = smov 64   ;;  %s1264_s18 = sshra.s32 %s1637_s1, 1 }
 0x1c9   : > { %v1004_v6 = vperm.slane %v2434_v58, 0  ;;  %v1002_v46 = vrot.slane %v2434_v58, 2  ;;  %vm932_vm1 = vcmp.ne.f32.partialorder %v2434_v58, 0.0  ;;  %v1001_v17 = vrot.slane %v2434_v58, 1  ;;  %s1267_s19 = sand.u32 1, %s1637_s1  ;;  %s1427_s20 = sshll.u32 %s1264_s18, 2 }
 0x1ca   : > { %v2450_v49 = vsel %vm932_vm1, 1.0, %v1641_v48  ;;  %v1003_v55 = vrot.slane %v2434_v58, 3  ;;  %v1044_v25 = vand.u32 127, %v1043_v38  ;;  %s1270_s21 = sadd.s32 %s1427_s20, %s1267_s19  ;;  %s926_s1 = sadd.s32 1, %s1637_s1  }
 0x1cb   : > { %v1006_v51 = vperm.slane %v1002_v46, 0  ;;  %v1005_v43 = vperm.slane %v1001_v17, 0  ;;  %s1271_s22 = scalar_lea.vmem [#allocation4], %s1270_s21  ;;  %p923_p0 = scmp.ge.s32.totalorder %s926_s1, 2  }
 0x1cc   : > { %v2432_v8 = vld [vmem:[%s930_s16] sm:$0xf]  ;;  %v1007_v36 = vperm.slane %v1003_v55, 0  ;;  %s1374_s12 = sshll.u32 (%p923_p0), %s2599_s8, 4  ;;  %s1375_s12 = int_to_ptr.hbm [resolvable:$true] %s1374_s12 }
 0x1cd   : > { %vm935_vm14 = vcmp.ne.f32.partialorder %v2432_v8, 0.0  ;;  %1418 = vmatpush.xpose.msk.msra.mxu1 %vm74_vm0, %v2432_v8  ;;  %v1012_v53 = vsub.f32 %v1004_v6, %v2432_v8  ;;  %v1014_v11 = vsub.f32 %v1006_v51, %v2432_v8  ;;  %v1013_v19 = vsub.f32 %v1005_v43, %v2432_v8 }
 0x1ce   : > { %v2441_v3 = vsel %vm935_vm14, 1.0, %v1641_v48  ;;  %v1015_v5 = vsub.f32 %v1007_v36, %v2432_v8 }
 0x1cf   : > { %944 = vperm.xlu0 %1574, %v2441_v3   ;;  %v1016_v35 = vand.u32 2147483647, %v1012_v53  ;;  %v1018_v10 = vand.u32 2147483647, %v1014_v11  ;;  %v1017_v0 = vand.u32 2147483647, %v1013_v19 }
 0x1d0   : > { %1419 = vmatmul.msk.f32.vlgmr.msra.gmra.mxu1 %vm74_vm0, %v2434_v58  ;;  %v1019_v14 = vand.u32 2147483647, %v1015_v5 }
 0x1d1   : > { %v1021_v29 = vsel %vm1020_vm15, %v1016_v35, 0.0  ;;  %v1027_v44 = vsel %vm1020_vm15, %v1018_v10, 0.0  ;;  %v1024_v12 = vsel %vm1020_vm15, %v1017_v0, 0.0 }
 0x1d2   : > { %1022 = vadd.xlane.f32.xlu1 %v1021_v29  ;;  %1028 = vadd.xlane.f32.xlu2 %v1027_v44  ;;  %v1030_v7 = vsel %vm1020_vm15, %v1019_v14, 0.0 }
 0x1d7   : > { %940 = vperm.xlu0 %1574, %v2450_v49  }
 0x1da   : > { %1025 = vadd.xlane.f32.xlu1 %v1024_v12  ;;  %1031 = vadd.xlane.f32.xlu2 %v1030_v7 }
 0x241   : > { %v945_v52 = vpop.permute.xlu0 %944 }
 0x242   : > { %1416 = vmatpush.xpose.msk.msra.mxu0 %vm946_vm2, %v945_v52 }
 0x245   : > { %v1023_v33 = vpop.xlane.xlu1 %1022  ;;  %v1029_v34 = vpop.xlane.xlu2 %1028 }
 0x246   : > { %v1035_v60 = vmul.f32 %v1034_v50, %v1023_v33  ;;  %v1037_v28 = vmul.f32 %v1034_v50, %v1029_v34 }
 0x248   : > { %v1045_v1 = vperm.slane %v1035_v60, %v1044_v25  ;;  %v1047_v62 = vperm.slane %v1037_v28, %v1044_v25 }
 0x249   : > { %v941_v45 = vpop.permute.xlu0 %940 }
 0x24a   : > { %1417 = vmatmul.msk.f32.vlgmr.msra.gmra.mxu0 %vm946_vm2, %v941_v45  ;;  %vm1103_vm2 = vcmask 1043456  }
 0x24b   : > { %1423 = vmatpush.msk.msra.mxu3 %vm1103_vm2, %v2434_v58  ;;  %1421 = vmatpush.msk.msra.mxu2 %vm1103_vm2, %v2432_v8 }
 0x24d   : > { %v1026_v16 = vpop.xlane.xlu1 %1025  ;;  %v1032_v9 = vpop.xlane.xlu2 %1031 }
 0x24e   : > { %v1036_v27 = vmul.f32 %v1034_v50, %v1026_v16  ;;  %v1038_v13 = vmul.f32 %v1034_v50, %v1032_v9  ;;  %v995_v47 = vpop.f32.mrf.mxu1 }
 0x24f   : > { %v999_v59 = vmul.f32 %v998_v24, %v995_v47 }
 0x250   : > { %v1046_v32 = vperm.slane %v1036_v27, %v1044_v25  ;;  %v1048_v61 = vperm.slane %v1038_v13, %v1044_v25 }
 0x252   : > { %v1049_v31 = vsel %vm584_vm13, %v1046_v32, %v1045_v1 }
 0x253   : > { %v1050_v21 = vsel %vm586_vm3, %v1047_v62, %v1049_v31 }
 0x254   : > { %v1051_v26 = vsel %vm588_vm4, %v1048_v61, %v1050_v21 }
 0x2c7   : > { %v968_v18 = vpop.f32.mrf.mxu0 }
 0x2c8   : > { %vm971_vm5 = vcmp.gt.f32.partialorder %v968_v18, 0.0 }
 0x2c9   : > { %v1053_v54 = vsel %vm971_vm5, %v1051_v26, -10000000.0  ;;  %v1000_v40 = vsel %vm971_vm5, %v999_v59, -10000000.0  ;;  %vm1214_vm5 = vcmp.gt.f32.partialorder %v2450_v49, 0.0 }
 0x2ca   : > { %v1420_v30 = vmul.f32 -1.442695, %v1053_v54  ;;  %v1215_v62 = vsel %vm1214_vm5, 1, %v1640_v22 }
 0x2cc   : > { %1576 = vpow2.f32 %v1420_v30 }
 0x2d2   : > { %v1577_v57 = vpop.eup %1576 }
 0x2d3   : > { %v1057_v42 = vadd.f32 1.0, %v1577_v57 }
 0x2d5   : > { %1578 = vrcp.f32 %v1057_v42  ;;  %v1069_v20 = vand.u32 2147483648, %v1057_v42  ;;  %v1067_v2 = vand.u32 2147483647, %v1057_v42  ;;  %vm1063_vm7 = vweird.f32 %v1057_v42 }
 0x2d7   : > { %v1070_v39 = vor.u32 1.1754944e-38, %v1069_v20  ;;  %vm1068_vm9 = vcmp.eq.f32.partialorder %v1067_v2, 8.507059e+37 }
 0x2db   : > { %v1579_v23 = vpop.eup %1578 }
 0x2dc   : > { %v1059_v15 = vmul.f32 %v1579_v23, %v1057_v42  ;;  %vm1064_vm6 = vweird.f32 %v1579_v23 }
 0x2dd   : > { %vm1065_vm8 = vmor %vm1063_vm7, %vm1064_vm6  ;;  %vm1228_vm6 = vcmp.gt.f32.partialorder %v2441_v3, 0.0  ;;  %vm1099_vm7 = vcmask 31744  }
 0x2de   : > { %v1060_v56 = vsub.f32 1.0, %v1059_v15  ;;  %v1229_v31 = vsel %vm1228_vm6, 1, %v1640_v22 }
 0x2e0   : > { %v1061_v63 = vmul.f32 %v1579_v23, %v1060_v56 }
 0x2e2   : > { %v1062_v37 = vadd.f32 %v1579_v23, %v1061_v63 }
 0x2e4   : > { %v1066_v41 = vsel %vm1065_vm8, %v1579_v23, %v1062_v37 }
 0x2e5   : > { %v1071_v4 = vsel %vm1068_vm9, %v1070_v39, %v1066_v41 }
 0x2e6   : > { %v1073_v6 = vmul.f32 %v1071_v4, %v1000_v40 }
 0x2e8   : > { %v1075_v46 = vsel %vm1074_vm10, %v1073_v6, -inf }
 0x2e9   : > { %1076 = vmax.xlane.f32.xlu0 %v1075_v46  ;;  %v1126_v48 = vrot.slane %v1075_v46, 4 }
 0x2eb   : > { %v1127_v53 = vmax.f32 %v1075_v46, %v1126_v48 }
 0x2ed   : > { %v1128_v51 = vrot.slane %v1127_v53, 2 }
 0x2ef   : > { %v1129_v35 = vmax.f32 %v1127_v53, %v1128_v51 }
 0x2f1   : > { %v1130_v11 = vrot.slane %v1129_v35, 1 }
 0x2f3   : > { %v1131_v29 = vmax.f32 %v1129_v35, %v1130_v11 }
 0x2f5   : > { %v1132_v10 = vsub.f32 %v1073_v6, %v1131_v29 }
 0x2f7   : > { %v1133_v44 = vmul.f32 1.442695, %v1132_v10 }
 0x2f9   : > { %1580 = vpow2.f32 %v1133_v44 }
 0x2ff   : > { %v1581_v17 = vpop.eup %1580 }
 0x300   : > { %v1135_v43 = vsel %vm1074_vm10, %v1581_v17, 0.0 }
 0x301   : > { %v1136_v55 = vrot.slane %v1135_v43, 4 }
 0x303   : > { %v1137_v19 = vadd.f32 %v1136_v55, %v1135_v43 }
 0x305   : > { %v1138_v36 = vrot.slane %v1137_v19, 2 }
 0x307   : > { %v1139_v0 = vadd.f32 %v1138_v36, %v1137_v19  ;;  %v1289_v36 = vld [vmem:[%s2596_s5 + $0x78] sm:$0xff] (%p923_p0) }
 0x308   :  { %1316 = vmatpush.msra.mxu0 (%p923_p0), %v1289_v36 }
 0x309   : > { %v1140_v5 = vrot.slane %v1139_v0, 1 }
 0x30b   : > { %v1141_v12 = vadd.f32 %v1140_v5, %v1139_v0  ;;  %v1305_v0 = vld [vmem:[%s2596_s5 + $0xf8] sm:$0xff] (%p923_p0)  ;;  %v1304_v5 = vld [vmem:[%s2596_s5 + $0xf0] sm:$0xff] (%p923_p0) }
 0x30c   :  { %1336 = vmatpush.msra.mxu1 (%p923_p0), %v1305_v0 }
 0x30d   : > { %1582 = vrcp.f32 %v1141_v12  ;;  %v1153_v45 = vand.u32 2147483648, %v1141_v12  ;;  %v1151_v34 = vand.u32 2147483647, %v1141_v12  ;;  %vm1147_vm12 = vweird.f32 %v1141_v12 }
 0x30e   :  { %1337 = vmatpush.msra.mxu1 (%p923_p0), %v1304_v5 }
 0x30f   : > { %v1154_v16 = vor.u32 1.1754944e-38, %v1153_v45  ;;  %vm1152_vm1 = vcmp.eq.f32.partialorder %v1151_v34, 8.507059e+37  ;;  %v1285_v45 = vld [vmem:[%s2596_s5 + $0x58] sm:$0xff] (%p923_p0)  ;;  %v1284_v34 = vld [vmem:[%s2596_s5 + $0x50] sm:$0xff] (%p923_p0) }
 0x313   : > { %v1583_v14 = vpop.eup %1582 }
 0x314   : > { %v1143_v7 = vmul.f32 %v1583_v14, %v1141_v12  ;;  %vm1148_vm11 = vweird.f32 %v1583_v14  ;;  %v1287_v12 = vld [vmem:[%s2596_s5 + $0x68] sm:$0xff] (%p923_p0) }
 0x315   : > { %vm1149_vm14 = vmor %vm1147_vm12, %vm1148_vm11 }
 0x316   : > { %v1144_v52 = vsub.f32 1.0, %v1143_v7  ;;  %v1286_v7 = vld [vmem:[%s2596_s5 + $0x60] sm:$0xff] (%p923_p0) }
 0x318   : > { %v1145_v33 = vmul.f32 %v1583_v14, %v1144_v52  ;;  %v1302_v52 = vld [vmem:[%s2596_s5 + $0xe0] sm:$0xff] (%p923_p0) }
 0x31a   : > { %v1146_v50 = vadd.f32 %v1583_v14, %v1145_v33  ;;  %v1301_v33 = vld [vmem:[%s2596_s5 + $0xd8] sm:$0xff] (%p923_p0) }
 0x31c   : > { %v1150_v25 = vsel %vm1149_vm14, %v1583_v14, %v1146_v50  ;;  %v1303_v14 = vld [vmem:[%s2596_s5 + $0xe8] sm:$0xff] (%p923_p0)  ;;  %v1300_v50 = vld [vmem:[%s2596_s5 + $0xd0] sm:$0xff] (%p923_p0) }
 0x31d   : > { %v1155_v60 = vsel %vm1152_vm1, %v1154_v16, %v1150_v25  ;;  %vm1257_vm1 = vcmask 1040384   ;;  %1338 = vmatpush.msra.mxu1 (%p923_p0), %v1303_v14  ;;  %v1283_v16 = vld [vmem:[%s2596_s5 + $0x48] sm:$0xff] (%p923_p0) }
 0x31e   : > { %v1156_v27 = vmul.f32 %v1581_v17, %v1155_v60  ;;  %v1299_v25 = vld [vmem:[%s2596_s5 + $0xc8] sm:$0xff] (%p923_p0) }
 0x31f   :  { %1339 = vmatpush.msra.mxu1 (%p923_p0), %v1302_v52 }
 0x320   : > { %1157 = vxpose.xlu2.b32.start.end [1/1] (short) (narrow) %v1156_v27, 8  ;;  %v1282_v27 = vld [vmem:[%s2596_s5 + $0x40] sm:$0xff] (%p923_p0) }
 0x321   :  { %1340 = vmatpush.msra.mxu1 (%p923_p0), %v1301_v33 }
 0x323   :  { %1341 = vmatpush.msra.mxu1 (%p923_p0), %v1300_v50 }
 0x325   :  { %1342 = vmatpush.msra.mxu1 (%p923_p0), %v1299_v25 }
 0x35c   : > { %v1077_v28 = vpop.xlane.xlu0 %1076 }
 0x35d   : > { %v1078_v9 = vsub.f32 %v1073_v6, %v1077_v28  ;;  %v1298_v28 = vld [vmem:[%s2596_s5 + $0xc0] sm:$0xff] (%p923_p0) }
 0x35e   :  { %1343 = vmatpush.msra.mxu1 (%p923_p0), %v1298_v28 }
 0x35f   : > { %v1079_v1 = vmul.f32 1.442695, %v1078_v9  ;;  %v1281_v9 = vld [vmem:[%s2596_s5 + $0x38] sm:$0xff] (%p923_p0) }
 0x361   : > { %1584 = vpow2.f32 %v1079_v1  ;;  %v1297_v1 = vld [vmem:[%s2596_s5 + $0xb8] sm:$0xff] (%p923_p0) }
 0x362   :  { %1344 = vmatpush.msra.mxu1 (%p923_p0), %v1297_v1 }
 0x367   : > { %v1585_v32 = vpop.eup %1584 }
 0x368   : > { %v1081_v13 = vsel %vm1074_vm10, %v1585_v32, 0.0 }
 0x369   : > { %1082 = vadd.xlane.f32.xlu1 %v1081_v13  ;;  %v1296_v13 = vld [vmem:[%s2596_s5 + $0xb0] sm:$0xff] (%p923_p0) }
 0x36a   :  { %1345 = vmatpush.msra.mxu1 (%p923_p0), %v1296_v13 }
 0x382   : > { %1217 = vperm.xlu1 %1575, %v1215_v62   ;;  %v1279_v62 = vld [vmem:[%s2596_s5 + $0x28] sm:$0xff] (%p923_p0) }
 0x38a   : > { %1231 = vperm.xlu1 %1575, %v1229_v31   ;;  %v1295_v31 = vld [vmem:[%s2596_s5 + $0xa8] sm:$0xff] (%p923_p0) }
 0x38b   :  { %1346 = vmatpush.msra.mxu1 (%p923_p0), %v1295_v31 }
 0x3b9   : > { %v1173_v8 = vpop.trf.xlu2 }
 0x3ba   : > { %1424 = vmatmul.msk.f32.vlgmr.msra.gmra.mxu3 %vm1099_vm7, %v1173_v8  ;;  %v1278_v8 = vld [vmem:[%s2596_s5 + $0x20] sm:$0xff] (%p923_p0) }
 0x3dc   : > { %v1083_v58 = vpop.xlane.xlu1 %1082 }
 0x3dd   : > { %1586 = vrcp.f32 %v1083_v58  ;;  %v1095_v26 = vand.u32 2147483648, %v1083_v58  ;;  %v1093_v49 = vand.u32 2147483647, %v1083_v58  ;;  %vm1089_vm9 = vweird.f32 %v1083_v58 }
 0x3df   : > { %v1096_v57 = vor.u32 1.1754944e-38, %v1095_v26  ;;  %vm1094_vm11 = vcmp.eq.f32.partialorder %v1093_v49, 8.507059e+37  ;;  %v1292_v26 = vld [vmem:[%s2596_s5 + $0x90] sm:$0xff] (%p923_p0)  ;;  %v1291_v49 = vld [vmem:[%s2596_s5 + $0x88] sm:$0xff] (%p923_p0) }
 0x3e3   : > { %v1587_v61 = vpop.eup %1586 }
 0x3e4   : > { %v1085_v21 = vmul.f32 %v1587_v61, %v1083_v58  ;;  %vm1090_vm8 = vweird.f32 %v1587_v61  ;;  %v1294_v58 = vld [vmem:[%s2596_s5 + $0xa0] sm:$0xff] (%p923_p0) }
 0x3e5   : > { %vm1091_vm10 = vmor %vm1089_vm9, %vm1090_vm8  ;;  %1347 = vmatpush.msra.mxu1 (%p923_p0), %v1294_v58 }
 0x3e6   : > { %v1086_v18 = vsub.f32 1.0, %v1085_v21  ;;  %v1293_v21 = vld [vmem:[%s2596_s5 + $0x98] sm:$0xff] (%p923_p0) }
 0x3e7   :  { %1348 = vmatpush.msra.mxu1 (%p923_p0), %v1293_v21 }
 0x3e8   : > { %v1087_v54 = vmul.f32 %v1587_v61, %v1086_v18  ;;  %v1276_v18 = vld [vmem:[%s2596_s5 + $0x10] sm:$0xff] (%p923_p0) }
 0x3e9   :  { %1349 = vmatpush.msra.mxu1 (%p923_p0), %v1292_v26 }
 0x3ea   : > { %v1088_v30 = vadd.f32 %v1587_v61, %v1087_v54  ;;  %v1275_v54 = vld [vmem:[%s2596_s5 + $0x8] sm:$0xff] (%p923_p0) }
 0x3eb   :  { %1350 = vmatpush.msra.mxu1 (%p923_p0), %v1291_v49 }
 0x3ec   : > { %v1092_v3 = vsel %vm1091_vm10, %v1587_v61, %v1088_v30  ;;  %v1277_v61 = vld [vmem:[%s2596_s5 + $0x18] sm:$0xff] (%p923_p0)  ;;  %v1274_v30 = vld [vmem:[%s2596_s5] sm:$0xff] (%p923_p0) }
 0x3ed   : > { %v1097_v22 = vsel %vm1094_vm11, %v1096_v57, %v1092_v3  ;;  %v1290_v57 = vld [vmem:[%s2596_s5 + $0x80] sm:$0xff] (%p923_p0) }
 0x3ee   : > { %v1098_v42 = vmul.f32 %v1585_v32, %v1097_v22  ;;  %v1280_v32 = vld [vmem:[%s2596_s5 + $0x30] sm:$0xff] (%p923_p0)  ;;  %1351 = vmatpush.msra.mxu1 (%p923_p0), %v1290_v57 }
 0x3f0   : > { %1422 = vmatmul.msk.f32.vlgmr.msra.gmra.mxu2 %vm1099_vm7, %v1098_v42  ;;  %v1588_v42 = vld [vmem:[%s2597_s6] ss:$0 sm:$0xff] (%p923_p0) }
 0x3f4   : > { %v1218_v23 = vpop.permute.xlu1 %1217 }
 0x3f5   : > { %vm1219_vm14 = vcmp.eq.s32.totalorder %v1218_v23, 1 }
 0x3fc   : > { %v1232_v15 = vpop.permute.xlu1 %1231 }
 0x3fd   : > { %vm1233_vm12 = vcmp.eq.s32.totalorder %v1232_v15, 1 }
 0x43d   : > { %v1211_v47 = vpop.f32.mrf.mxu3 }
 0x43e   : > { %v1234_v24 = vsel %vm1233_vm12, %v1211_v47, -inf }
 0x43f   : > { %v1235_v56 = vsel %vm1020_vm15, %v1234_v24, -inf }
 0x440   : > { %v1236_v20 = vrot.slane %v1235_v56, 4 }
 0x442   : > { %v1237_v63 = vmax.f32 %v1235_v56, %v1236_v20 }
 0x444   : > { %v1238_v2 = vrot.slane %v1237_v63, 2 }
 0x446   : > { %v1239_v59 = vmax.f32 %v1237_v63, %v1238_v2 }
 0x448   : > { %v1240_v37 = vrot.slane %v1239_v59, 1 }
 0x44a   : > { %v1241_v39 = vmax.f32 %v1239_v59, %v1240_v37 }
 0x44c   : > { %1245 = vrot.lane.b32.xlu2 %v1241_v39, %s1642_s4 }
 0x473   : > { %v1123_v41 = vpop.f32.mrf.mxu2 }
 0x474   : > { %v1220_v40 = vsel %vm1219_vm14, %v1123_v41, -inf }
 0x475   : > { %v1221_v4 = vsel %vm1020_vm15, %v1220_v40, -inf  ;;  %vm1262_vm15 = vcmp.lt.s32.totalorder %v1043_v38, 256  ;;  %v1288_v38 = vld [vmem:[%s2596_s5 + $0x70] sm:$0xff] (%p923_p0)  ;;  %s1643_s5 = smov (%p923_p0), [#allocation8]  }
 0x476   : > { %v1222_v6 = vrot.slane %v1221_v4, 4  ;;  %1317 = vmatpush.msra.mxu0 (%p923_p0), %v1288_v38  ;;  %s1372_s11 = sshll.u32 (%p923_p0), %s1643_s5, 4  ;;  %s1373_s11 = int_to_ptr.vmem [resolvable:$true] %s1372_s11 }
 0x478   : > { %v1223_v46 = vmax.f32 %v1221_v4, %v1222_v6  ;;  %1318 = vmatpush.msra.mxu0 (%p923_p0), %v1287_v12 }
 0x47a   : > { %v1224_v48 = vrot.slane %v1223_v46, 2  ;;  %1319 = vmatpush.msra.mxu0 (%p923_p0), %v1286_v7 }
 0x47c   : > { %v1225_v53 = vmax.f32 %v1223_v46, %v1224_v48  ;;  %1320 = vmatpush.msra.mxu0 (%p923_p0), %v1285_v45 }
 0x47e   : > { %v1226_v51 = vrot.slane %v1225_v53, 1  ;;  %1321 = vmatpush.msra.mxu0 (%p923_p0), %v1284_v34 }
 0x480   : > { %v1227_v35 = vmax.f32 %v1225_v53, %v1226_v51  ;;  %1322 = vmatpush.msra.mxu0 (%p923_p0), %v1283_v16 }
 0x482   : > { %v1243_v11 = vmul.f32 %v1241_v39, %v1227_v35  ;;  %v1242_v29 = vsub.f32 %v1227_v35, %v1241_v39  ;;  %1323 = vmatpush.msra.mxu0 (%p923_p0), %v1282_v27 }
 0x484   : > { %1249 = vrot.lane.b32.xlu1 %v1243_v11, %s1642_s4  ;;  %1324 = vmatpush.msra.mxu0 (%p923_p0), %v1281_v9 }
 0x486   :  { %1325 = vmatpush.msra.mxu0 (%p923_p0), %v1280_v32 }
 0x488   :  { %1326 = vmatpush.msra.mxu0 (%p923_p0), %v1279_v62 }
 0x48a   :  { %1327 = vmatpush.msra.mxu0 (%p923_p0), %v1278_v8 }
 0x48c   :  { %1328 = vmatpush.msra.mxu0 (%p923_p0), %v1277_v61 }
 0x48e   :  { %1329 = vmatpush.msra.mxu0 (%p923_p0), %v1276_v18 }
 0x490   :  { %1330 = vmatpush.msra.mxu0 (%p923_p0), %v1275_v54 }
 0x492   :  { %1331 = vmatpush.msra.mxu0 (%p923_p0), %v1274_v30 }
 0x4a6   : > { %v1246_v10 = vpop.permute.xlu2 %1245 }
 0x4a7   : > { %v1252_v55 = vsel %vm74_vm0, %v1227_v35, %v1246_v10 }
 0x4f6   : > { %v1250_v44 = vpop.permute.xlu1 %1249 }
 0x4f7   : > { %v1253_v17 = vsel %vm74_vm0, %v1242_v29, %v1250_v44  ;;  %925 = sbr.rel (!%p923_p0) target bundleno = 454 (0x1c6), region = 66  ;;  %vm1365_vm0 = vcmask (%p923_p0), 254976  }
 0x4f8   : > { %v1256_v43 = vrot.slane %v1253_v17, 7 }
 0x4fa   : > { %v1258_v19 = vsel %vm1257_vm1, %v1252_v55, %v1256_v43 }
 0x4fb   : > { %1272 = vst.msk [vmem:[%s1271_s22] ss:$2 sm:$0x3] %vm1262_vm15, %v1258_v19 }
 0x502   :  { %v1273_v60 = vld [vmem:[#allocation4] sm:$0xf] }
 0x503   :  { %1311 = vst [vmem:[#allocation1] ss:$4 sm:$0xff] %v1273_v60 }
 0x50a   :  { %v1312_v3 = vld.sshfl [vmem:[#allocation1] sm:$0xff pattern:$0x73625140]  ;;  %v1313_v22 = vld.sshfl [vmem:[#allocation1 + $0x8] sm:$0xff pattern:$0x73625140] }
 0x50b   :  { %1332 = vmatmul.f32.vlgmr.msra.gmra.mxu0 %v1312_v3  ;;  %1352 = vmatmul.f32.vlgmr.msra.gmra.mxu1 %v1313_v22 }
 0x588   :  { %v1333_v23 = vpop.f32.mrf.mxu0  ;;  %v1353_v15 = vpop.f32.mrf.mxu1 }
 0x589   :  { %v1334_v47 = vadd.f32 %v1588_v42, %v1333_v23 }
 0x58b   :  { %v1354_v24 = vadd.f32 %v1353_v15, %v1334_v47 }
 0x58d   :  { %v1358_v56 = vmul.f32 0.044715, %v1354_v24  ;;  %v1357_v63 = vmul.f32 0.7978846, %v1354_v24  ;;  %v1356_v39 = vmul.f32 0.5, %v1354_v24 }
 0x58f   :  { %v1359_v20 = vmul.f32 %v1358_v56, %v1354_v24 }
 0x591   :  { %v1360_v2 = vadd.f32 1.0, %v1359_v20 }
 0x593   :  { %v1361_v59 = vmul.f32 %v1360_v2, %v1357_v63 }
 0x595   :  { %1589 = vtanh.f32 %v1361_v59 }
 0x59b   :  { %v1590_v37 = vpop.eup %1589 }
 0x59c   :  { %v1363_v41 = vadd.f32 1.0, %v1590_v37 }
 0x59e   :  { %v1364_v40 = vmul.f32 %v1363_v41, %v1356_v39 }
 0x5a0   :  { %1366 = vst.msk [vmem:[#allocation8] sm:$0x3] %vm1365_vm0, %v1364_v40 }
 0x5a1   :  { %1377 = dma.vmem_to_hbm [thread:$0]  %s1373_s11, 32, %s1375_s12, [#allocation6]  }
 0x5a2   :  { %1633 = dma.done.wait [#allocation6], 32  }
 0x5a3   :  { %1634 = vsyncadd [#allocation6], 4294967264 }
 0x5a4   :  { %1382 = vsyncpa [#allocation6], 1 }
 0x5a5   :  { %1383 = vsyncpa [#allocation7], 1 }

</bundles_post_ra>
